<compile_context>
chip_gen: v7x
topology: tpu7x:2x2x1
jax: 0.10.0
libtpu: 0.0.40
codegen_flags: <defaults>
</compile_context>

<pallas_src>
import math
from functools import partial

import jax
import jax.numpy as jnp
from jax import lax
from jax.experimental import pallas as pl
from jax.experimental.pallas import tpu as pltpu

# Interior column offset inside the padded scratch. Multiple of 16 so bf16 (16,128)-packed
# stores of the expand output start sublane-aligned. Columns 0.._PADL-2 are never read.
# TODO(synk): on v7x (64 MiB VMEM) trim the dead left columns (put the single pad on the right).
_PADL = 16


def _resblock_kernel(x_ref, w1_ref, b1_ref, w2_ref, b2_ref, w3_ref, b3_ref,
                     o_ref, y1p_ref, *, rows_per_chunk):
    # x_ref  : (1, H, W, C)   bf16  full image of batch n (resident across the strip axis)
    # w1_ref : (C, M)         bf16  expand 1x1 (Cin, Cout)
    # b1_ref : (1, M)         f32
    # w2_ref : (9*M, M)       bf16  fea 3x3 in im2col layout: K = tap-major, Cin-minor
    # b2_ref : (1, M)         f32
    # w3_ref : (M, C)         bf16  reduce 1x1
    # b3_ref : (1, C)         f32
    # o_ref  : (1, tH, W*C)   f32   lane-dense output row strip
    # y1p_ref: VMEM (H+2, _PADL+W+1, M) bf16  bias-padded expand output
    #          (image columns live at [_PADL, _PADL+W))
    h = pl.program_id(1)
    _, H, W, C = x_ref.shape
    M = w1_ref.shape[1]
    tH = o_ref.shape[1]
    Wp = y1p_ref.shape[1]

    # ---- once per image: expand 1x1 conv + bias border ring (== pad_tensor(out, b1)) ----
    @pl.when(h == 0)
    def _expand_and_pad():
        b1v = b1_ref[...]                                    # (1, M) f32
        bias3 = b1v.reshape(1, 1, M)
        # Border ring only (interior overwritten below). A 1x1 conv over zero padding plus
        # bias equals the bias, which is exactly what pad_tensor writes on the ring.
        row_fill = jnp.broadcast_to(bias3, (1, Wp, M)).astype(y1p_ref.dtype)
        y1p_ref[0:1] = row_fill                              # top padded row
        y1p_ref[H + 1:H + 2] = row_fill                      # bottom padded row
        col_fill = jnp.broadcast_to(bias3, (H, 1, M)).astype(y1p_ref.dtype)
        y1p_ref[1:H + 1, _PADL - 1:_PADL, :] = col_fill      # left pad column
        y1p_ref[1:H + 1, _PADL + W:_PADL + W + 1, :] = col_fill  # right pad column

        # Interior expand, chunked by row blocks (bounds the live f32 temporary and overlaps
        # MXU work with the aligned scratch stores).
        w1v = w1_ref[...]
        n_chunks = H // rows_per_chunk

        def expand_chunk(ci, carry):
            r0 = ci * rows_per_chunk
            xc = x_ref[0, pl.ds(r0, rows_per_chunk), :, :].reshape(rows_per_chunk * W, C)
            y1c = jnp.dot(xc, w1v, preferred_element_type=jnp.float32) + b1v
            y1p_ref[pl.ds(1 + r0, rows_per_chunk), _PADL:_PADL + W, :] = (
                y1c.reshape(rows_per_chunk, W, M).astype(y1p_ref.dtype))
            return carry

        lax.fori_loop(0, n_chunks, expand_chunk, 0, unroll=True)

    # ---- per row strip: 3x3 conv as ONE K=9M matmul + identity + reduce 1x1 + residual ----
    row0 = pl.multiple_of(h * tH, tH)

    taps = []
    for dh in range(3):
        for dw in range(3):
            c0 = _PADL - 1 + dw
            taps.append(
                y1p_ref[pl.ds(row0 + dh, tH), c0:c0 + W, :].reshape(tH * W, M))
    patches = jnp.concatenate(taps, axis=-1)                 # (tH*W, 9M) bf16 im2col tile
    center = taps[4]                                         # == y1 on this strip (identity)

    acc = jnp.dot(patches, w2_ref[...], preferred_element_type=jnp.float32)
    out2 = acc + b2_ref[...] + center.astype(jnp.float32)    # fea_conv(out) + out_identity

    y3 = jnp.dot(out2.astype(w3_ref.dtype), w3_ref[...],
                 preferred_element_type=jnp.float32) + b3_ref[...]
    res = y3.reshape(tH, W, C) + x_ref[0, pl.ds(row0, tH), :, :].astype(jnp.float32)
    o_ref[0] = res.reshape(tH, W * C).astype(o_ref.dtype)    # lane-dense store


def _pick_tile_h(H, requested=None):
    """Largest legal strip height: divisor of H, multiple of 8 (sublane) or == H."""
    def ok(t):
        return 0 < t <= H and H % t == 0 and (t % 8 == 0 or t == H)
    if requested is not None and ok(requested):
        return requested
    cands = [t for t in range(8, min(32, H) + 1) if H % t == 0 and t % 8 == 0]
    return max(cands) if cands else H   # tiny images collapse to one strip per image


def _pick_rows_per_chunk(H, W):
    """Chunk the once-per-image expand matmul: ~>=512 rows per dot, <=8 unrolled chunks."""
    divs = [d for d in range(1, H + 1) if H % d == 0]
    good = [d for d in divs if d * W >= 512] or [H]
    rpc = min(good)
    while H // rpc > 8:
        rpc = min(d for d in divs if d > rpc)
    return rpc


def resblock_forward(x_nchw, w1_oihw, b1, w2_oihw, b2, w3_oihw, b3, *, tile_h=None):
    """x: (N, C, H, W); expand w1: (M, C, 1, 1); fea w2: (M, M, 3, 3); reduce w3: (C, M, 1, 1)."""
    N, C, H, W = x_nchw.shape
    M = w1_oihw.shape[0]
    tile_h = _pick_tile_h(H, tile_h)
    nH = H // tile_h
    rows_per_chunk = _pick_rows_per_chunk(H, W)

    # Host-side glue: layout + bf16 cast only (no padding pass, no duplicated residual input).
    cdt = jnp.bfloat16
    x = jnp.transpose(x_nchw, (0, 2, 3, 1)).astype(cdt)                     # NHWC bf16
    w1 = w1_oihw.reshape(M, C).T.astype(cdt)                                # (C, M)
    # fea 3x3 in im2col layout: K axis tap-major (dh, dw), Cin-minor -> (9M, M)
    w2 = jnp.transpose(w2_oihw, (2, 3, 1, 0)).reshape(9 * M, M).astype(cdt)
    w3 = w3_oihw.reshape(C, M).T.astype(cdt)                                # (M, C)
    b1r = b1.reshape(1, M).astype(jnp.float32)
    b2r = b2.reshape(1, M).astype(jnp.float32)
    b3r = b3.reshape(1, C).astype(jnp.float32)

    flops = 2 * N * H * W * (C * M + 9 * M * M + M * C)
    bytes_accessed = (2 * N * H * W * C            # x read (bf16)
                      + 4 * N * H * W * C          # out write (f32)
                      + 2 * (C * M + 9 * M * M + M * C) + 4 * (2 * M + C))

    # Explicit VMEM budget: scratch + 2x x-block + 2x out-strip + weights; raise the scoped
    # limit above the 16/32 MiB defaults, capped at 64 MiB so the value is legal on every chip.
    scratch_bytes = (H + 2) * (_PADL + W + 1) * M * 2
    est = (scratch_bytes + 2 * H * W * C * 2 + 2 * tile_h * W * C * 4
           + 2 * (C * M + 9 * M * M + M * C) + 4 * (2 * M + C))
    vmem_limit = int(min(64 << 20, max(32 << 20, 2 * est)))

    kernel = partial(_resblock_kernel, rows_per_chunk=rows_per_chunk)

    out_flat = pl.pallas_call(
        kernel,
        out_shape=jax.ShapeDtypeStruct((N, H, W * C), jnp.float32),
        grid_spec=pltpu.PrefetchScalarGridSpec(
            num_scalar_prefetch=0,
            grid=(N, nH),
            in_specs=[
                pl.BlockSpec((1, H, W, C), lambda n, h: (n, 0, 0, 0)),  # DMA'd once per image
                pl.BlockSpec((C, M), lambda n, h: (0, 0)),
                pl.BlockSpec((1, M), lambda n, h: (0, 0)),
                pl.BlockSpec((9 * M, M), lambda n, h: (0, 0)),
                pl.BlockSpec((1, M), lambda n, h: (0, 0)),
                pl.BlockSpec((M, C), lambda n, h: (0, 0)),
                pl.BlockSpec((1, C), lambda n, h: (0, 0)),
            ],
            out_specs=pl.BlockSpec((1, tile_h, W * C), lambda n, h: (n, h, 0)),
            scratch_shapes=[
                pltpu.VMEM((H + 2, _PADL + W + 1, M), jnp.bfloat16),
            ],
        ),
        compiler_params=pltpu.CompilerParams(
            dimension_semantics=("parallel", "arbitrary"),
            vmem_limit_bytes=vmem_limit),
        cost_estimate=pl.CostEstimate(
            flops=flops, transcendentals=0, bytes_accessed=bytes_accessed),
    )(x, w1, b1r, w2, b2r, w3, b3r)

    out_nhwc = out_flat.reshape(N, H, W, C)
    return jnp.transpose(out_nhwc, (0, 3, 1, 2))             # back to NCHW


def reference_forward(x, w1, b1, w2, b2, w3, b3):
    """Pure-JAX f32 reference of the PyTorch ResBlock forward (pad_tensor fills border with b1)."""
    conv = partial(lax.conv_general_dilated, window_strides=(1, 1), padding="VALID",
                   dimension_numbers=("NCHW", "OIHW", "NCHW"),
                   precision=lax.Precision.HIGHEST)
    out = conv(x, w1) + b1.reshape(1, -1, 1, 1)
    identity = out
    N, _, H, W = x.shape
    padded = jnp.broadcast_to(b1.reshape(1, -1, 1, 1), (N, w1.shape[0], H + 2, W + 2))
    padded = padded.at[:, :, 1:-1, 1:-1].set(out)
    out = conv(padded, w2) + b2.reshape(1, -1, 1, 1) + identity
    out = conv(out, w3) + b3.reshape(1, -1, 1, 1)
    return out + x


if __name__ == "__main__":
    N, n_feats, H, W = 2, 4, 16, 16
    ratio = 2
    M = ratio * n_feats

    key = jax.random.PRNGKey(0)
    ks = jax.random.split(key, 7)
    x = jax.random.normal(ks[0], (N, n_feats, H, W), jnp.float32)

    def conv_init(kw, kb, shape):
        fan_in = shape[1] * shape[2] * shape[3]
        bound = 1.0 / math.sqrt(fan_in)
        w = jax.random.uniform(kw, shape, jnp.float32, -bound, bound)
        b = jax.random.uniform(kb, (shape[0],), jnp.float32, -bound, bound)
        return w, b

    w1, b1 = conv_init(ks[1], ks[2], (M, n_feats, 1, 1))
    w2, b2 = conv_init(ks[3], ks[4], (M, M, 3, 3))
    w3, b3 = conv_init(ks[5], ks[6], (n_feats, M, 1, 1))

    out = resblock_forward(x, w1, b1, w2, b2, w3, b3, tile_h=8)   # tile_h=8 -> exercises 2 strips
    out = jax.block_until_ready(out)
    assert out.shape == (N, n_feats, H, W)
    assert out.dtype == jnp.float32

    # The kernel uses bf16 matmul inputs (f32 accumulation), so the parity check is re-baselined:
    # compare against an f32 reference fed the SAME bf16-rounded inputs/weights, which isolates
    # kernel-introduced error (bf16 y1p scratch + bf16 cast before the reduce conv).
    rnd = lambda a: a.astype(jnp.bfloat16).astype(jnp.float32)
    ref = reference_forward(rnd(x), rnd(w1), b1, rnd(w2), b2, rnd(w3), b3)
    assert jnp.allclose(out, ref, atol=2e-2, rtol=2e-2), "mismatch vs reference"
    print("KERNEL_OK")
</pallas_src>

<mosaic_0001>
module attributes {stable_mosaic.version = 11 : i64} {
  func.func @_resblock_kernel(%arg0: i32, %arg1: i32, %arg2: memref<1x16x16x4xbf16, #tpu.memory_space<vmem>>, %arg3: memref<4x8xbf16, #tpu.memory_space<vmem>>, %arg4: memref<1x8xf32, #tpu.memory_space<vmem>>, %arg5: memref<72x8xbf16, #tpu.memory_space<vmem>>, %arg6: memref<1x8xf32, #tpu.memory_space<vmem>>, %arg7: memref<8x4xbf16, #tpu.memory_space<vmem>>, %arg8: memref<1x4xf32, #tpu.memory_space<vmem>>, %arg9: memref<1x8x64xf32, #tpu.memory_space<vmem>>, %arg10: memref<18x33x8xbf16, #tpu.memory_space<vmem>>) attributes {dimension_semantics = [#tpu.dimension_semantics<parallel>, #tpu.dimension_semantics<arbitrary>], iteration_bounds = array<i64: 2, 2>, scalar_prefetch = 0 : i64, scratch_operands = 1 : i64, tpu.core_type = #tpu.core_type<tc>, window_params = [{transform_indices = @transform_0, window_bounds = array<i64: 1, 16, 16, 4>}, {pipeline_mode = #tpu.pipeline_mode<synchronous>, transform_indices = @transform_1, window_bounds = array<i64: 4, 8>}, {pipeline_mode = #tpu.pipeline_mode<synchronous>, transform_indices = @transform_2, window_bounds = array<i64: 1, 8>}, {pipeline_mode = #tpu.pipeline_mode<synchronous>, transform_indices = @transform_3, window_bounds = array<i64: 72, 8>}, {pipeline_mode = #tpu.pipeline_mode<synchronous>, transform_indices = @transform_4, window_bounds = array<i64: 1, 8>}, {pipeline_mode = #tpu.pipeline_mode<synchronous>, transform_indices = @transform_5, window_bounds = array<i64: 8, 4>}, {pipeline_mode = #tpu.pipeline_mode<synchronous>, transform_indices = @transform_6, window_bounds = array<i64: 1, 4>}, {transform_indices = @transform_7, window_bounds = array<i64: 1, 8, 64>}]} {
    %c0_i32 = arith.constant 0 : i32
    %0 = arith.cmpi eq, %arg1, %c0_i32 : i32
    %1 = arith.extui %0 : i1 to i32
    %c0_i32_0 = arith.constant 0 : i32
    %2 = arith.cmpi ne, %1, %c0_i32_0 : i32
    scf.if %2 {
      %c0_37 = arith.constant 0 : index
      %c0_38 = arith.constant 0 : index
      %65 = vector.load %arg4[%c0_37, %c0_38] : memref<1x8xf32, #tpu.memory_space<vmem>>, vector<1x8xf32>
      %66 = vector.shape_cast %65 : vector<1x8xf32> to vector<1x1x8xf32>
      %67 = vector.shape_cast %66 : vector<1x1x8xf32> to vector<1x1x8xf32>
      %68 = vector.broadcast %67 : vector<1x1x8xf32> to vector<1x33x8xf32>
      %69 = arith.truncf %68 : vector<1x33x8xf32> to vector<1x33x8xbf16>
      %c0_39 = arith.constant 0 : index
      %c0_40 = arith.constant 0 : index
      %c0_41 = arith.constant 0 : index
      %70 = vector.load %arg10[%c0_39, %c0_40, %c0_41] : memref<18x33x8xbf16, #tpu.memory_space<vmem>>, vector<1x33x8xbf16>
      tpu.vector_store %arg10[%c0_39, %c0_40, %c0_41], %69 {strides = array<i32>} : memref<18x33x8xbf16, #tpu.memory_space<vmem>>, vector<1x33x8xbf16>,
      %c17_42 = arith.constant 17 : index
      %c0_43 = arith.constant 0 : index
      %c0_44 = arith.constant 0 : index
      %71 = vector.load %arg10[%c17_42, %c0_43, %c0_44] : memref<18x33x8xbf16, #tpu.memory_space<vmem>>, vector<1x33x8xbf16>
      tpu.vector_store %arg10[%c17_42, %c0_43, %c0_44], %69 {strides = array<i32>} : memref<18x33x8xbf16, #tpu.memory_space<vmem>>, vector<1x33x8xbf16>,
      %72 = vector.shape_cast %66 : vector<1x1x8xf32> to vector<1x1x8xf32>
      %73 = vector.broadcast %72 : vector<1x1x8xf32> to vector<16x1x8xf32>
      %74 = arith.truncf %73 : vector<16x1x8xf32> to vector<16x1x8xbf16>
      %c1 = arith.constant 1 : index
      %c15_45 = arith.constant 15 : index
      %c0_46 = arith.constant 0 : index
      %75 = vector.load %arg10[%c1, %c15_45, %c0_46] : memref<18x33x8xbf16, #tpu.memory_space<vmem>>, vector<16x1x8xbf16>
      tpu.vector_store %arg10[%c1, %c15_45, %c0_46], %74 {strides = array<i32>} : memref<18x33x8xbf16, #tpu.memory_space<vmem>>, vector<16x1x8xbf16>,
      %c1_47 = arith.constant 1 : index
      %c32 = arith.constant 32 : index
      %c0_48 = arith.constant 0 : index
      %76 = vector.load %arg10[%c1_47, %c32, %c0_48] : memref<18x33x8xbf16, #tpu.memory_space<vmem>>, vector<16x1x8xbf16>
      tpu.vector_store %arg10[%c1_47, %c32, %c0_48], %74 {strides = array<i32>} : memref<18x33x8xbf16, #tpu.memory_space<vmem>>, vector<16x1x8xbf16>,
      %c0_49 = arith.constant 0 : index
      %c0_50 = arith.constant 0 : index
      %77 = vector.load %arg3[%c0_49, %c0_50] : memref<4x8xbf16, #tpu.memory_space<vmem>>, vector<4x8xbf16>
      %c0_i32_51 = arith.constant 0 : i32
      %c16_i32 = arith.constant 16 : i32
      %78 = arith.muli %c0_i32_51, %c16_i32 : i32
      %c0_52 = arith.constant 0 : index
      %79 = arith.index_cast %78 : i32 to index
      %c0_53 = arith.constant 0 : index
      %c0_54 = arith.constant 0 : index
      %80 = vector.load %arg2[%c0_52, %79, %c0_53, %c0_54] : memref<1x16x16x4xbf16, #tpu.memory_space<vmem>>, vector<1x16x16x4xbf16>
      %81 = vector.shape_cast %80 : vector<1x16x16x4xbf16> to vector<16x16x4xbf16>
      %82 = vector.shape_cast %81 : vector<16x16x4xbf16> to vector<256x4xbf16>
      %cst_55 = arith.constant dense<0.000000e+00> : vector<256x8xf32>
      %83 = tpu.matmul %82, %77, %cst_55 {dimension_numbers = #tpu.dot_dimension_numbers<[1], [0], [0], [1], [0, 0, 1, 1], [], []>} : vector<256x4xbf16>, vector<4x8xbf16>, vector<256x8xf32> -> vector<256x8xf32>
      %84 = vector.broadcast %65 : vector<1x8xf32> to vector<256x8xf32>
      %85 = arith.addf %83, %84 : vector<256x8xf32>
      %86 = vector.shape_cast %85 : vector<256x8xf32> to vector<16x16x8xf32>
      %87 = arith.truncf %86 : vector<16x16x8xf32> to vector<16x16x8xbf16>
      %c1_i32_56 = arith.constant 1 : i32
      %88 = arith.addi %c1_i32_56, %78 : i32
      %89 = arith.index_cast %88 : i32 to index
      %c16_57 = arith.constant 16 : index
      %c0_58 = arith.constant 0 : index
      %90 = vector.load %arg10[%89, %c16_57, %c0_58] : memref<18x33x8xbf16, #tpu.memory_space<vmem>>, vector<16x16x8xbf16>
      tpu.vector_store %arg10[%89, %c16_57, %c0_58], %87 {strides = array<i32>} : memref<18x33x8xbf16, #tpu.memory_space<vmem>>, vector<16x16x8xbf16>,
      %c1_i32_59 = arith.constant 1 : i32
    } else {
    }
    %c8_i32 = arith.constant 8 : i32
    %3 = arith.muli %arg1, %c8_i32 : i32
    %4 = tpu.assume_multiple %3, 8 : i32
    %c0_i32_1 = arith.constant 0 : i32
    %5 = arith.addi %4, %c0_i32_1 : i32
    %6 = arith.index_cast %5 : i32 to index
    %c15 = arith.constant 15 : index
    %c0 = arith.constant 0 : index
    %7 = vector.load %arg10[%6, %c15, %c0] : memref<18x33x8xbf16, #tpu.memory_space<vmem>>, vector<8x16x8xbf16>
    %8 = vector.shape_cast %7 : vector<8x16x8xbf16> to vector<128x8xbf16>
    %c0_i32_2 = arith.constant 0 : i32
    %9 = arith.addi %4, %c0_i32_2 : i32
    %10 = arith.index_cast %9 : i32 to index
    %c16 = arith.constant 16 : index
    %c0_3 = arith.constant 0 : index
    %11 = vector.load %arg10[%10, %c16, %c0_3] : memref<18x33x8xbf16, #tpu.memory_space<vmem>>, vector<8x16x8xbf16>
    %12 = vector.shape_cast %11 : vector<8x16x8xbf16> to vector<128x8xbf16>
    %c0_i32_4 = arith.constant 0 : i32
    %13 = arith.addi %4, %c0_i32_4 : i32
    %14 = arith.index_cast %13 : i32 to index
    %c17 = arith.constant 17 : index
    %c0_5 = arith.constant 0 : index
    %15 = vector.load %arg10[%14, %c17, %c0_5] : memref<18x33x8xbf16, #tpu.memory_space<vmem>>, vector<8x16x8xbf16>
    %16 = vector.shape_cast %15 : vector<8x16x8xbf16> to vector<128x8xbf16>
    %c1_i32 = arith.constant 1 : i32
    %17 = arith.addi %4, %c1_i32 : i32
    %18 = arith.index_cast %17 : i32 to index
    %c15_6 = arith.constant 15 : index
    %c0_7 = arith.constant 0 : index
    %19 = vector.load %arg10[%18, %c15_6, %c0_7] : memref<18x33x8xbf16, #tpu.memory_space<vmem>>, vector<8x16x8xbf16>
    %20 = vector.shape_cast %19 : vector<8x16x8xbf16> to vector<128x8xbf16>
    %c1_i32_8 = arith.constant 1 : i32
    %21 = arith.addi %4, %c1_i32_8 : i32
    %22 = arith.index_cast %21 : i32 to index
    %c16_9 = arith.constant 16 : index
    %c0_10 = arith.constant 0 : index
    %23 = vector.load %arg10[%22, %c16_9, %c0_10] : memref<18x33x8xbf16, #tpu.memory_space<vmem>>, vector<8x16x8xbf16>
    %24 = vector.shape_cast %23 : vector<8x16x8xbf16> to vector<128x8xbf16>
    %c1_i32_11 = arith.constant 1 : i32
    %25 = arith.addi %4, %c1_i32_11 : i32
    %26 = arith.index_cast %25 : i32 to index
    %c17_12 = arith.constant 17 : index
    %c0_13 = arith.constant 0 : index
    %27 = vector.load %arg10[%26, %c17_12, %c0_13] : memref<18x33x8xbf16, #tpu.memory_space<vmem>>, vector<8x16x8xbf16>
    %28 = vector.shape_cast %27 : vector<8x16x8xbf16> to vector<128x8xbf16>
    %c2_i32 = arith.constant 2 : i32
    %29 = arith.addi %4, %c2_i32 : i32
    %30 = arith.index_cast %29 : i32 to index
    %c15_14 = arith.constant 15 : index
    %c0_15 = arith.constant 0 : index
    %31 = vector.load %arg10[%30, %c15_14, %c0_15] : memref<18x33x8xbf16, #tpu.memory_space<vmem>>, vector<8x16x8xbf16>
    %32 = vector.shape_cast %31 : vector<8x16x8xbf16> to vector<128x8xbf16>
    %c2_i32_16 = arith.constant 2 : i32
    %33 = arith.addi %4, %c2_i32_16 : i32
    %34 = arith.index_cast %33 : i32 to index
    %c16_17 = arith.constant 16 : index
    %c0_18 = arith.constant 0 : index
    %35 = vector.load %arg10[%34, %c16_17, %c0_18] : memref<18x33x8xbf16, #tpu.memory_space<vmem>>, vector<8x16x8xbf16>
    %36 = vector.shape_cast %35 : vector<8x16x8xbf16> to vector<128x8xbf16>
    %c2_i32_19 = arith.constant 2 : i32
    %37 = arith.addi %4, %c2_i32_19 : i32
    %38 = arith.index_cast %37 : i32 to index
    %c17_20 = arith.constant 17 : index
    %c0_21 = arith.constant 0 : index
    %39 = vector.load %arg10[%38, %c17_20, %c0_21] : memref<18x33x8xbf16, #tpu.memory_space<vmem>>, vector<8x16x8xbf16>
    %40 = vector.shape_cast %39 : vector<8x16x8xbf16> to vector<128x8xbf16>
    %41 = tpu.concatenate %8, %12, %16, %20, %24, %28, %32, %36, %40 in 1 : vector<128x8xbf16>, vector<128x8xbf16>, vector<128x8xbf16>, vector<128x8xbf16>, vector<128x8xbf16>, vector<128x8xbf16>, vector<128x8xbf16>, vector<128x8xbf16>, vector<128x8xbf16> -> vector<128x72xbf16>
    %c0_22 = arith.constant 0 : index
    %c0_23 = arith.constant 0 : index
    %42 = vector.load %arg5[%c0_22, %c0_23] : memref<72x8xbf16, #tpu.memory_space<vmem>>, vector<72x8xbf16>
    %cst = arith.constant dense<0.000000e+00> : vector<128x8xf32>
    %43 = tpu.matmul %41, %42, %cst {dimension_numbers = #tpu.dot_dimension_numbers<[1], [0], [0], [1], [0, 0, 1, 1], [], []>} : vector<128x72xbf16>, vector<72x8xbf16>, vector<128x8xf32> -> vector<128x8xf32>
    %c0_24 = arith.constant 0 : index
    %c0_25 = arith.constant 0 : index
    %44 = vector.load %arg6[%c0_24, %c0_25] : memref<1x8xf32, #tpu.memory_space<vmem>>, vector<1x8xf32>
    %45 = vector.broadcast %44 : vector<1x8xf32> to vector<128x8xf32>
    %46 = arith.addf %43, %45 : vector<128x8xf32>
    %47 = arith.extf %24 : vector<128x8xbf16> to vector<128x8xf32>
    %48 = arith.addf %46, %47 : vector<128x8xf32>
    %49 = arith.truncf %48 : vector<128x8xf32> to vector<128x8xbf16>
    %c0_26 = arith.constant 0 : index
    %c0_27 = arith.constant 0 : index
    %50 = vector.load %arg7[%c0_26, %c0_27] : memref<8x4xbf16, #tpu.memory_space<vmem>>, vector<8x4xbf16>
    %cst_28 = arith.constant dense<0.000000e+00> : vector<128x4xf32>
    %51 = tpu.matmul %49, %50, %cst_28 {dimension_numbers = #tpu.dot_dimension_numbers<[1], [0], [0], [1], [0, 0, 1, 1], [], []>} : vector<128x8xbf16>, vector<8x4xbf16>, vector<128x4xf32> -> vector<128x4xf32>
    %c0_29 = arith.constant 0 : index
    %c0_30 = arith.constant 0 : index
    %52 = vector.load %arg8[%c0_29, %c0_30] : memref<1x4xf32, #tpu.memory_space<vmem>>, vector<1x4xf32>
    %53 = vector.broadcast %52 : vector<1x4xf32> to vector<128x4xf32>
    %54 = arith.addf %51, %53 : vector<128x4xf32>
    %55 = vector.shape_cast %54 : vector<128x4xf32> to vector<8x16x4xf32>
    %c0_31 = arith.constant 0 : index
    %56 = arith.index_cast %4 : i32 to index
    %c0_32 = arith.constant 0 : index
    %c0_33 = arith.constant 0 : index
    %57 = vector.load %arg2[%c0_31, %56, %c0_32, %c0_33] : memref<1x16x16x4xbf16, #tpu.memory_space<vmem>>, vector<1x8x16x4xbf16>
    %58 = vector.shape_cast %57 : vector<1x8x16x4xbf16> to vector<8x16x4xbf16>
    %59 = arith.extf %58 : vector<8x16x4xbf16> to vector<8x16x4xf32>
    %60 = arith.addf %55, %59 : vector<8x16x4xf32>
    %61 = vector.shape_cast %60 : vector<8x16x4xf32> to vector<8x64xf32>
    %c0_34 = arith.constant 0 : index
    %c0_35 = arith.constant 0 : index
    %c0_36 = arith.constant 0 : index
    %62 = vector.load %arg9[%c0_34, %c0_35, %c0_36] : memref<1x8x64xf32, #tpu.memory_space<vmem>>, vector<1x8x64xf32>
    %63 = vector.shape_cast %62 : vector<1x8x64xf32> to vector<8x64xf32>
    %64 = vector.shape_cast %61 : vector<8x64xf32> to vector<1x8x64xf32>
    tpu.vector_store %arg9[%c0_34, %c0_35, %c0_36], %64 {strides = array<i32>} : memref<1x8x64xf32, #tpu.memory_space<vmem>>, vector<1x8x64xf32>,
    return
  }
  func.func @transform_0(%arg0: i32, %arg1: i32) -> (i32, i32, i32, i32) {
    %c0_i32 = arith.constant 0 : i32
    %c0_i32_0 = arith.constant 0 : i32
    %c0_i32_1 = arith.constant 0 : i32
    %c0_i32_2 = arith.constant 0 : i32
    return %arg0, %c0_i32, %c0_i32_0, %c0_i32_1 : i32, i32, i32, i32
  }
  func.func @transform_1(%arg0: i32, %arg1: i32) -> (i32, i32) {
    %c0_i32 = arith.constant 0 : i32
    %c0_i32_0 = arith.constant 0 : i32
    %c0_i32_1 = arith.constant 0 : i32
    return %c0_i32, %c0_i32_0 : i32, i32
  }
  func.func @transform_2(%arg0: i32, %arg1: i32) -> (i32, i32) {
    %c0_i32 = arith.constant 0 : i32
    %c0_i32_0 = arith.constant 0 : i32
    %c0_i32_1 = arith.constant 0 : i32
    return %c0_i32, %c0_i32_0 : i32, i32
  }
  func.func @transform_3(%arg0: i32, %arg1: i32) -> (i32, i32) {
    %c0_i32 = arith.constant 0 : i32
    %c0_i32_0 = arith.constant 0 : i32
    %c0_i32_1 = arith.constant 0 : i32
    return %c0_i32, %c0_i32_0 : i32, i32
  }
  func.func @transform_4(%arg0: i32, %arg1: i32) -> (i32, i32) {
    %c0_i32 = arith.constant 0 : i32
    %c0_i32_0 = arith.constant 0 : i32
    %c0_i32_1 = arith.constant 0 : i32
    return %c0_i32, %c0_i32_0 : i32, i32
  }
  func.func @transform_5(%arg0: i32, %arg1: i32) -> (i32, i32) {
    %c0_i32 = arith.constant 0 : i32
    %c0_i32_0 = arith.constant 0 : i32
    %c0_i32_1 = arith.constant 0 : i32
    return %c0_i32, %c0_i32_0 : i32, i32
  }
  func.func @transform_6(%arg0: i32, %arg1: i32) -> (i32, i32) {
    %c0_i32 = arith.constant 0 : i32
    %c0_i32_0 = arith.constant 0 : i32
    %c0_i32_1 = arith.constant 0 : i32
    return %c0_i32, %c0_i32_0 : i32, i32
  }
  func.func @transform_7(%arg0: i32, %arg1: i32) -> (i32, i32, i32) {
    %c0_i32 = arith.constant 0 : i32
    %c0_i32_0 = arith.constant 0 : i32
    return %arg0, %arg1, %c0_i32 : i32, i32, i32
  }
}

</mosaic_0001>

<bundles_post_ra>
// kernel: tpu_custom_call.1
= control target key start
LH: loop header
LB: loop body
LE: loop exit
PB: predicated region body
PF: predicated region fallthrough
CT: control target
= control target key end

     0   :  { %s5376_s0 = inlined_call_operand.vmem [shape: bf16[2,16,16,4], index: 0, kind: input, shape index: {}]   ;;  %s5377_s1 = inlined_call_operand.vmem [shape: bf16[4,8], index: 1, kind: input, shape index: {}]   ;;  %s5378_s2 = inlined_call_operand.vmem [shape: f32[1,8], index: 2, kind: input, shape index: {}]   ;;  %s5379_s3 = inlined_call_operand.vmem [shape: bf16[72,8], index: 3, kind: input, shape index: {}]   ;;  %s5380_s4 = inlined_call_operand.vmem [shape: f32[1,8], index: 4, kind: input, shape index: {}]   ;;  %s5381_s5 = inlined_call_operand.vmem [shape: bf16[8,4], index: 5, kind: input, shape index: {}]   ;;  %s5382_s6 = inlined_call_operand.vmem [shape: f32[1,4], index: 6, kind: input, shape index: {}]   ;;  %s5383_s7 = inlined_call_operand.hbm [shape: f32[2,16,64], index: 7, kind: output, shape index: {}]  }
   0x1   :  { %5403 = sst [smem:[#allocation8_spill]] %s5376_s0 }
   0x2   :  { %5404 = sst [smem:[#allocation9_spill]] %s5377_s1 }
   0x3   :  { %5405 = sst [smem:[#allocation10_spill]] %s5378_s2 }
   0x4   :  { %12 = vsyncpa [#allocation4], 0 }
   0x5   :  { %14 = vsyncpa [#allocation4 + $0x1], 0  ;;  %s4050_s24 = smov 0   ;;  %s4052_s25 = smov 0  }
   0x6   :  { %s4054_s26 = smov 0   ;;  %s4056_s27 = smov 0  }
   0x7   :  { %s4058_s28 = smov 0   ;;  %s4060_s29 = smov 0  }
   0x8   :  { %s4062_s30 = smov 0   ;;  %s4064_s8 = smov 0  }
   0x9 LB: > { %s3277_s9 = sadd.s32 4294967295, %s3989_s8   ;;  %s3278_s10 = sadd.s32 4294967294, %s3989_s8   ;;  %s3989_s8 = sphi %s4064_s8, %s20_s8   ;;  %s3985_s30 = sphi %s4062_s30, %s5441_s30   ;;  %s3981_s29 = sphi %s4060_s29, %s5440_s29   ;;  %s3977_s28 = sphi %s4058_s28, %s5439_s28   ;;  %s3973_s27 = sphi %s4056_s27, %s5438_s27   ;;  %s3969_s26 = sphi %s4054_s26, %s5437_s26   ;;  %s3965_s25 = sphi %s4052_s25, %s5436_s25   ;;  %s3961_s24 = sphi %s4050_s24, %s5435_s24  }
   0xa   : > { %s29_s11 = sadd.s32 1, %s3981_s29  ;;  %s32_s12 = sadd.s32 1, %s3985_s30 }
   0xb   : > { %p30_p0 = scmp.ge.s32.totalorder %s29_s11, 2  ;;  %p203_p1 = scmp.ne.s32.totalorder %s3969_s26, %s3965_s25 }
   0xc   : > { %p204_p2 = scmp.eq.s32.totalorder %s3277_s9, 3  ;;  %p209_p5 = scmp.ne.s32.totalorder %s3965_s25, %s3961_s24 }
   0xd   : > { %s5443_s11 = smov (%p30_p0, %s29_s11), 0  ;;  %s5445_s12 = smov (!%p30_p0, %s32_s12), %s3985_s30 }
   0xe   : > { %s189_s13 = ssub.s32 %s3981_s29, %s5443_s11  ;;  %p4101_p3 = por %p204_p2, %p203_p1 }
   0xf   : > { %p34_p4 = scmp.ge.s32.totalorder %s5445_s12, 2  ;;  %p210_p6 = scmp.eq.s32.totalorder %s3278_s10, 3 }
  0x10   : > { %p3281_p7 = scmp.ge.s32.totalorder %s3989_s8, 1  ;;  %p254_p9 = scmp.lt.s32.totalorder %s3989_s8, 5 }
  0x11   : > { %s5447_s12 = smov (%p34_p4, %s5445_s12), 0  ;;  %p4110_p8 = por %p210_p6, %p209_p5 }
  0x12   : > { %s188_s16 = ssub.s32 %s3985_s30, %s5447_s12  ;;  %s193_s17 = sadd.s32 1, %s3969_s26 }
  0x13   : > { %s190_s18 = sor.u32 %s189_s13, %s188_s16  ;;  %p255_p10 = pnand %p3281_p7, %p254_p9 }
  0x14   : > { %p191_p11 = scmp.eq.s32.totalorder %s190_s18, 0 }
  0x15   : > { %258 = sbr.rel (%p255_p10) target bundleno = 1183 (0x49f), region = 48 }
  0x16   : > { %s4119_s19 = scalar_select %p191_p11, %s3969_s26, %s193_s17  }
  0x1c   : > { %s5384_s20 = sand.u32 1, %s3965_s25   ;;  %p286_p12 = scmp.lt.s32.totalorder %s3977_s28, 1 }
  0x1d   : > { %s4125_s21 = sshll.u32 %s5384_s20, 3  ;;  %s5408_s0 = sld [smem:[#allocation8_spill]] }
  0x1e   : > { %s287_s22 = scalar_select %p286_p12, %s3977_s28, 1 }
  0x1f   : > { %p3285_p13 = scmp.ne.s32.totalorder %s3973_s27, 0 }
  0x20   : > { %s3549_s23 = sshll.u32 %s287_s22, 7  ;;  %s5409_s1 = sld [smem:[#allocation9_spill]] (!%p3285_p13)  ;;  %vm598_vm0 = vcmask (!%p3285_p13), 1041408   ;;  %vm549_vm1 = vcmask (!%p3285_p13), 31744   ;;  %v298_v7 = vlaneseq (!%p3285_p13)  ;;  %vm313_vm2 = vcmask (!%p3285_p13), 57344  }
  0x21   : > { %295 = sbr.rel (%p3285_p13) target bundleno = 287 (0x11f), region = 52  ;;  %s5410_s2 = sld [smem:[#allocation10_spill]] (!%p3285_p13)  ;;  %vm337_vm3 = vcmask (!%p3285_p13), 60419   ;;  %vm314_vm4 = vsmask.f32 (!%p3285_p13), 256  ;;  %vm308_vm7 = vcmask (!%p3285_p13), 60416  }
  0x22   : > { %v299_v11 = vshrl.u32 (!%p3285_p13), %v298_v7, 7  ;;  %v316_v21 = vld [vmem:[#allocation2 + $0x10] sm:$0x1] (!%p3285_p13)  ;;  %v324_v22 = vld [vmem:[#allocation2 + $0x164] sm:$0x1] (!%p3285_p13)  ;;  %vm4169_vm5 = vmand (!%p3285_p13), %vm313_vm2, %vm314_vm4 }
  0x23   : > { %s4131_s13 = scalar_lea.vmem %s5408_s0, %s3549_s23  ;;  %vm338_vm6 = vsmask.f32 (!%p3285_p13), 7950  ;;  %v340_v25 = vld [vmem:[#allocation2 + $0x18] sm:$0x8] (!%p3285_p13)  ;;  %v343_v26 = vld [vmem:[#allocation2 + $0x2c] sm:$0x8] (!%p3285_p13) }
  0x24   : > { %v3838_v1 = vld [vmem:[%s4131_s13] sm:$0xff] (!%p3285_p13)   ;;  %v3840_v4 = vld [vmem:[%s4131_s13 + $0x8] sm:$0xff] (!%p3285_p13)   ;;  %v3842_v6 = vld [vmem:[%s4131_s13 + $0x10] sm:$0xff] (!%p3285_p13)   ;;  %v300_v14 = vsub.s32 (!%p3285_p13), 0, %v299_v11 }
  0x25   : > { %v3839_v3 = vld [vmem:[%s4131_s13 + $0x40] sm:$0xff] (!%p3285_p13)   ;;  %3667 = vmatprep.mubr.msk.bf16.mxu0 (!%p3285_p13), %vm549_vm1, %v3838_v1  ;;  %v3841_v5 = vld [vmem:[%s4131_s13 + $0x48] sm:$0xff] (!%p3285_p13)   ;;  %v3843_v8 = vld [vmem:[%s4131_s13 + $0x50] sm:$0xff] (!%p3285_p13)  }
  0x26   : > { %v436_v0 = vld [vmem:[%s5409_s1] sm:$0x3] (!%p3285_p13)  ;;  %3683 = vmatprep.mubr.msk.bf16.mxu1 (!%p3285_p13), %vm549_vm1, %v3839_v3  ;;  %v3844_v9 = vld [vmem:[%s4131_s13 + $0x18] sm:$0xff] (!%p3285_p13)   ;;  %v3848_v15 = vld [vmem:[%s4131_s13 + $0x28] sm:$0xff] (!%p3285_p13)  }
  0x27   : > { %3745 = vmatprep.subr.msk.bf16.mxu0 (!%p3285_p13), %vm598_vm0, %v436_v0  ;;  %3746 = vmatprep.subr.msk.bf16.mxu1 (!%p3285_p13), %vm598_vm0, %v436_v0  ;;  %v600_v2 = vsel (!%p3285_p13), %vm598_vm0, %v436_v0, 0  ;;  %v3845_v10 = vld [vmem:[%s4131_s13 + $0x58] sm:$0xff] (!%p3285_p13)   ;;  %v3846_v12 = vld [vmem:[%s4131_s13 + $0x20] sm:$0xff] (!%p3285_p13)   ;;  %v3849_v16 = vld [vmem:[%s4131_s13 + $0x68] sm:$0xff] (!%p3285_p13)  }
  0x28   : > { %3666 = vmatpush3.bf16.msra.mxu0 %v600_v2  ;;  %3744 = vmatpush3.bf16.msra.mxu1 %v600_v2  ;;  %v3847_v13 = vld [vmem:[%s4131_s13 + $0x60] sm:$0xff]   ;;  %v3850_v17 = vld [vmem:[%s4131_s13 + $0x30] sm:$0xff]   ;;  %vm4176_vm8 = vmand %vm337_vm3, %vm338_vm6 }
  0x29   : > { %v296_v18 = vld [vmem:[%s5410_s2] sm:$0x1]  ;;  %v3851_v19 = vld [vmem:[%s4131_s13 + $0x70] sm:$0xff]   ;;  %v346_v30 = vld [vmem:[#allocation2 + $0x40] sm:$0x8] }
  0x2a   : > { %v4165_v20 = vrot.slane %v296_v18, %v300_v14  ;;  %v4167_v23 = vpack.c.bf16 %v296_v18, %v296_v18  ;;  %v349_v31 = vld [vmem:[#allocation2 + $0x54] sm:$0x8]  ;;  %v352_v32 = vld [vmem:[#allocation2 + $0x68] sm:$0x8]  ;;  %v355_v33 = vld [vmem:[#allocation2 + $0x7c] sm:$0x8] }
  0x2b   : > { %3668 = vmatmul.mubr.msk.bf16.vlgmr.msra.gmra.mrb[0].mxu0 %vm549_vm1, %v3840_v4  ;;  %3684 = vmatmul.mubr.msk.bf16.vlgmr.msra.gmra.mrb[0].mxu1 %vm549_vm1, %v3841_v5  ;;  %v358_v34 = vld [vmem:[#allocation2 + $0x90] sm:$0x8]  ;;  %v361_v38 = vld [vmem:[#allocation2 + $0xa4] sm:$0x8]  ;;  %v364_v39 = vld [vmem:[#allocation2 + $0xb8] sm:$0x8] }
  0x2c   : > { %3671 = vmatprep.mubr.msk.bf16.mxu0 %vm549_vm1, %v3842_v6  ;;  %3687 = vmatprep.mubr.msk.bf16.mxu1 %vm549_vm1, %v3843_v8  ;;  %v3550_v27 = vpack.c.bf16 %v4165_v20, %v4165_v20  ;;  %v332_v28 = vshll.u32 %v4167_v23, 16  ;;  %v367_v40 = vld [vmem:[#allocation2 + $0xcc] sm:$0x8]  ;;  %v370_v41 = vld [vmem:[#allocation2 + $0xe0] sm:$0x8]  ;;  %v4197_v43 = vld [vmem:[%s4131_s13 + $0x38] sm:$0xff]  }
  0x2d   : > { %v373_v42 = vld [vmem:[#allocation2 + $0xf4] sm:$0x8]  ;;  %v376_v48 = vld [vmem:[#allocation2 + $0x108] sm:$0x8]  ;;  %v379_v49 = vld [vmem:[#allocation2 + $0x11c] sm:$0x8] }
  0x2e   : > { %309 = vst.msk [vmem:[#allocation2] sm:$0xf] %vm308_vm7, %v3550_v27  ;;  %310 = vst.msk [vmem:[#allocation2 + $0x4] sm:$0xf] %vm308_vm7, %v3550_v27  ;;  %v317_v35 = vsel %vm4169_vm5, %v3550_v27, %v316_v21  ;;  %v325_v36 = vsel %vm4169_vm5, %v3550_v27, %v324_v22  ;;  %v334_v37 = vrot.slane %v332_v28, 5  ;;  %v4208_v51 = vld [vmem:[%s4131_s13 + $0x78] sm:$0xff]  }
  0x2f   : > { %311 = vst.msk [vmem:[#allocation2 + $0x8] sm:$0xf] %vm308_vm7, %v3550_v27  ;;  %312 = vst.msk [vmem:[#allocation2 + $0xc] sm:$0xf] %vm308_vm7, %v3550_v27  ;;  %v382_v50 = vld [vmem:[#allocation2 + $0x130] sm:$0x8] }
  0x30   : > { %320 = vst.msk [vmem:[#allocation2 + $0x154] sm:$0xf] %vm308_vm7, %v3550_v27  ;;  %321 = vst.msk [vmem:[#allocation2 + $0x158] sm:$0xf] %vm308_vm7, %v3550_v27  ;;  %v341_v44 = vsel %vm4176_vm8, %v334_v37, %v340_v25  ;;  %v344_v45 = vsel %vm4176_vm8, %v334_v37, %v343_v26  ;;  %v347_v46 = vsel %vm4176_vm8, %v334_v37, %v346_v30  ;;  %v385_v56 = vld [vmem:[#allocation2 + $0x144] sm:$0x8] }
  0x31   : > { %322 = vst.msk [vmem:[#allocation2 + $0x15c] sm:$0xf] %vm308_vm7, %v3550_v27  ;;  %323 = vst.msk [vmem:[#allocation2 + $0x160] sm:$0xf] %vm308_vm7, %v3550_v27  ;;  %v350_v47 = vsel %vm4176_vm8, %v334_v37, %v349_v31  ;;  %v353_v52 = vsel %vm4176_vm8, %v334_v37, %v352_v32  ;;  %v356_v53 = vsel %vm4176_vm8, %v334_v37, %v355_v33  ;;  %v388_v57 = vld [vmem:[#allocation2 + $0x24] sm:$0x1] }
  0x32   : > { %318 = vst [vmem:[#allocation2 + $0x10] sm:$0x1] %v317_v35  ;;  %326 = vst [vmem:[#allocation2 + $0x164] sm:$0x1] %v325_v36  ;;  %v359_v54 = vsel %vm4176_vm8, %v334_v37, %v358_v34  ;;  %v362_v55 = vsel %vm4176_vm8, %v334_v37, %v361_v38  ;;  %v391_v58 = vld [vmem:[#allocation2 + $0x38] sm:$0x1]  ;;  %v365_v59 = vsel %vm4176_vm8, %v334_v37, %v364_v39 }
  0x33   : > { %3672 = vmatmul.mubr.msk.bf16.gmra.mrb[4].mxu0 %vm549_vm1, %v3844_v9  ;;  %3688 = vmatmul.mubr.msk.bf16.gmra.mrb[4].mxu1 %vm549_vm1, %v3845_v10  ;;  %342 = vst [vmem:[#allocation2 + $0x18] sm:$0x8] %v341_v44  ;;  %345 = vst [vmem:[#allocation2 + $0x2c] sm:$0x8] %v344_v45  ;;  %v368_v60 = vsel %vm4176_vm8, %v334_v37, %v367_v40  ;;  %v371_v61 = vsel %vm4176_vm8, %v334_v37, %v370_v41  ;;  %v394_v63 = vld [vmem:[#allocation2 + $0x4c] sm:$0x1] }
  0x34   : > { %3675 = vmatprep.mubr.msk.bf16.mxu0 %vm549_vm1, %v3846_v12  ;;  %3691 = vmatprep.mubr.msk.bf16.mxu1 %vm549_vm1, %v3847_v13  ;;  %348 = vst [vmem:[#allocation2 + $0x40] sm:$0x8] %v347_v46  ;;  %351 = vst [vmem:[#allocation2 + $0x54] sm:$0x8] %v350_v47  ;;  %v374_v62 = vsel %vm4176_vm8, %v334_v37, %v373_v42  ;;  %v397_v0 = vld [vmem:[#allocation2 + $0x60] sm:$0x1]  ;;  %v377_v2 = vsel %vm4176_vm8, %v334_v37, %v376_v48 }
  0x35   : > { %354 = vst [vmem:[#allocation2 + $0x68] sm:$0x8] %v353_v52  ;;  %357 = vst [vmem:[#allocation2 + $0x7c] sm:$0x8] %v356_v53  ;;  %v400_v1 = vld [vmem:[#allocation2 + $0x74] sm:$0x1]  ;;  %v380_v3 = vsel %vm4176_vm8, %v334_v37, %v379_v49  ;;  %v383_v4 = vsel %vm4176_vm8, %v334_v37, %v382_v50  ;;  %v386_v5 = vsel %vm4176_vm8, %v334_v37, %v385_v56 }
  0x36   : > { %360 = vst [vmem:[#allocation2 + $0x90] sm:$0x8] %v359_v54  ;;  %363 = vst [vmem:[#allocation2 + $0xa4] sm:$0x8] %v362_v55  ;;  %v403_v6 = vld [vmem:[#allocation2 + $0x88] sm:$0x1]  ;;  %v389_v9 = vsel %vm4169_vm5, %v4167_v23, %v388_v57  ;;  %v392_v10 = vsel %vm4169_vm5, %v4167_v23, %v391_v58  ;;  %v395_v11 = vsel %vm4169_vm5, %v4167_v23, %v394_v63 }
  0x37   : > { %366 = vst [vmem:[#allocation2 + $0xb8] sm:$0x8] %v365_v59  ;;  %369 = vst [vmem:[#allocation2 + $0xcc] sm:$0x8] %v368_v60  ;;  %v406_v7 = vld [vmem:[#allocation2 + $0x9c] sm:$0x1]  ;;  %v398_v12 = vsel %vm4169_vm5, %v4167_v23, %v397_v0 }
  0x38   : > { %372 = vst [vmem:[#allocation2 + $0xe0] sm:$0x8] %v371_v61  ;;  %375 = vst [vmem:[#allocation2 + $0xf4] sm:$0x8] %v374_v62  ;;  %v409_v8 = vld [vmem:[#allocation2 + $0xb0] sm:$0x1]  ;;  %v407_v18 = vsel %vm4169_vm5, %v4167_v23, %v406_v7 }
  0x39   : > { %378 = vst [vmem:[#allocation2 + $0x108] sm:$0x8] %v377_v2  ;;  %381 = vst [vmem:[#allocation2 + $0x11c] sm:$0x8] %v380_v3  ;;  %v412_v13 = vld [vmem:[#allocation2 + $0xc4] sm:$0x1] }
  0x3a   : > { %384 = vst [vmem:[#allocation2 + $0x130] sm:$0x8] %v383_v4  ;;  %387 = vst [vmem:[#allocation2 + $0x144] sm:$0x8] %v386_v5  ;;  %v415_v14 = vld [vmem:[#allocation2 + $0xd8] sm:$0x1]  ;;  %v413_v26 = vsel %vm4169_vm5, %v4167_v23, %v412_v13 }
  0x3b   : > { %3676 = vmatmul.mubr.msk.bf16.gmra.mrb[8].mxu0 %vm549_vm1, %v3848_v15  ;;  %3692 = vmatmul.mubr.msk.bf16.gmra.mrb[8].mxu1 %vm549_vm1, %v3849_v16  ;;  %v418_v15 = vld [vmem:[#allocation2 + $0xec] sm:$0x1]  ;;  %390 = vst [vmem:[#allocation2 + $0x24] sm:$0x1] %v389_v9  ;;  %393 = vst [vmem:[#allocation2 + $0x38] sm:$0x1] %v392_v10  ;;  %v401_v16 = vsel %vm4169_vm5, %v4167_v23, %v400_v1  ;;  %v416_v27 = vsel %vm4169_vm5, %v4167_v23, %v415_v14 }
  0x3c   : > { %3679 = vmatprep.mubr.msk.bf16.mxu0 %vm549_vm1, %v3850_v17  ;;  %3695 = vmatprep.mubr.msk.bf16.mxu1 %vm549_vm1, %v3851_v19  ;;  %396 = vst [vmem:[#allocation2 + $0x4c] sm:$0x1] %v395_v11  ;;  %399 = vst [vmem:[#allocation2 + $0x60] sm:$0x1] %v398_v12  ;;  %v404_v17 = vsel %vm4169_vm5, %v4167_v23, %v403_v6  ;;  %v410_v19 = vsel %vm4169_vm5, %v4167_v23, %v409_v8  ;;  %v421_v21 = vld [vmem:[#allocation2 + $0x100] sm:$0x1] }
  0x3d   : > { %v424_v22 = vld [vmem:[#allocation2 + $0x114] sm:$0x1]  ;;  %v427_v25 = vld [vmem:[#allocation2 + $0x128] sm:$0x1]  ;;  %402 = vst [vmem:[#allocation2 + $0x74] sm:$0x1] %v401_v16  ;;  %v419_v28 = vsel %vm4169_vm5, %v4167_v23, %v418_v15  ;;  %v422_v29 = vsel %vm4169_vm5, %v4167_v23, %v421_v21 }
  0x3e   : > { %405 = vst [vmem:[#allocation2 + $0x88] sm:$0x1] %v404_v17  ;;  %408 = vst [vmem:[#allocation2 + $0x9c] sm:$0x1] %v407_v18  ;;  %v430_v30 = vld [vmem:[#allocation2 + $0x13c] sm:$0x1]  ;;  %v425_v32 = vsel %vm4169_vm5, %v4167_v23, %v424_v22  ;;  %v428_v33 = vsel %vm4169_vm5, %v4167_v23, %v427_v25 }
  0x3f   : > { %411 = vst [vmem:[#allocation2 + $0xb0] sm:$0x1] %v410_v19  ;;  %v433_v31 = vld [vmem:[#allocation2 + $0x150] sm:$0x1]  ;;  %414 = vst [vmem:[#allocation2 + $0xc4] sm:$0x1] %v413_v26  ;;  %v431_v34 = vsel %vm4169_vm5, %v4167_v23, %v430_v30 }
  0x40   : > { %417 = vst [vmem:[#allocation2 + $0xd8] sm:$0x1] %v416_v27  ;;  %420 = vst [vmem:[#allocation2 + $0xec] sm:$0x1] %v419_v28  ;;  %v434_v35 = vsel %vm4169_vm5, %v4167_v23, %v433_v31 }
  0x41   : > { %423 = vst [vmem:[#allocation2 + $0x100] sm:$0x1] %v422_v29  ;;  %426 = vst [vmem:[#allocation2 + $0x114] sm:$0x1] %v425_v32 }
  0x42   : > { %429 = vst [vmem:[#allocation2 + $0x128] sm:$0x1] %v428_v33  ;;  %432 = vst [vmem:[#allocation2 + $0x13c] sm:$0x1] %v431_v34 }
  0x43   : > { %3680 = vmatmul.mubr.msk.bf16.gmra.mrb[12].mxu0 %vm549_vm1, %v4197_v43  ;;  %3696 = vmatmul.mubr.msk.bf16.gmra.mrb[12].mxu1 %vm549_vm1, %v4208_v51  ;;  %435 = vst [vmem:[#allocation2 + $0x150] sm:$0x1] %v434_v35 }
  0xfe   : > { %v3669_v36 = vpop.f32.mrb[0].mxu0  ;;  %v3685_v38 = vpop.f32.mrb[0].mxu1 }
  0xff   : > { %v645_v37 = vadd.f32 %v3669_v36, %v4165_v20  ;;  %v636_v39 = vpop.f32.mrb[1].mxu0  ;;  %v709_v40 = vadd.f32 %v3685_v38, %v4165_v20  ;;  %v700_v42 = vpop.f32.mrb[1].mxu1 }
 0x100   : > { %v637_v41 = vadd.f32 %v636_v39, %v4165_v20  ;;  %v3670_v43 = vpop.f32.mrb[2].mxu0  ;;  %v701_v45 = vadd.f32 %v700_v42, %v4165_v20  ;;  %v3686_v24 = vpop.f32.mrb[2].mxu1 }
 0x101   : > { %v3554_v44 = vpack.c.bf16 %v645_v37, %v645_v37  ;;  %v648_v23 = vadd.f32 %v3670_v43, %v4165_v20  ;;  %v639_v46 = vpop.f32.mrb[3].mxu0  ;;  %v3570_v47 = vpack.c.bf16 %v709_v40, %v709_v40  ;;  %v712_v49 = vadd.f32 %v3686_v24, %v4165_v20  ;;  %v703_v51 = vpop.f32.mrb[3].mxu1 }
 0x102   : > { %v3552_v48 = vpack.c.bf16 %v637_v41, %v637_v41  ;;  %v640_v50 = vadd.f32 %v639_v46, %v4165_v20  ;;  %v3568_v52 = vpack.c.bf16 %v701_v45, %v701_v45  ;;  %v704_v54 = vadd.f32 %v703_v51, %v4165_v20 }
 0x103   : > { %893 = vst.msk [vmem:[#allocation2 + $0x30] sm:$0xf] %vm308_vm7, %v3554_v44  ;;  %v3555_v53 = vpack.c.bf16 %v648_v23, %v648_v23  ;;  %909 = vst.msk [vmem:[#allocation2 + $0xd0] sm:$0xf] %vm308_vm7, %v3570_v47  ;;  %v3571_v55 = vpack.c.bf16 %v712_v49, %v712_v49 }
 0x104   : > { %891 = vst.msk [vmem:[#allocation2 + $0x1c] sm:$0xf] %vm308_vm7, %v3552_v48  ;;  %v3553_v56 = vpack.c.bf16 %v640_v50, %v640_v50  ;;  %907 = vst.msk [vmem:[#allocation2 + $0xbc] sm:$0xf] %vm308_vm7, %v3568_v52  ;;  %v3569_v57 = vpack.c.bf16 %v704_v54, %v704_v54 }
 0x105   : > { %894 = vst.msk [vmem:[#allocation2 + $0x34] sm:$0xf] %vm308_vm7, %v3555_v53  ;;  %910 = vst.msk [vmem:[#allocation2 + $0xd4] sm:$0xf] %vm308_vm7, %v3571_v55 }
 0x106   : > { %892 = vst.msk [vmem:[#allocation2 + $0x20] sm:$0xf] %vm308_vm7, %v3553_v56  ;;  %v3673_v58 = vpop.f32.mrb[4].mxu0  ;;  %908 = vst.msk [vmem:[#allocation2 + $0xc0] sm:$0xf] %vm308_vm7, %v3569_v57  ;;  %v3689_v60 = vpop.f32.mrb[4].mxu1 }
 0x107   : > { %v661_v59 = vadd.f32 %v3673_v58, %v4165_v20  ;;  %v652_v61 = vpop.f32.mrb[5].mxu0  ;;  %v725_v62 = vadd.f32 %v3689_v60, %v4165_v20  ;;  %v716_v0 = vpop.f32.mrb[5].mxu1 }
 0x108   : > { %v653_v63 = vadd.f32 %v652_v61, %v4165_v20  ;;  %v3674_v1 = vpop.f32.mrb[6].mxu0  ;;  %v717_v3 = vadd.f32 %v716_v0, %v4165_v20  ;;  %v3690_v5 = vpop.f32.mrb[6].mxu1 }
 0x109   : > { %v3558_v2 = vpack.c.bf16 %v661_v59, %v661_v59  ;;  %v664_v4 = vadd.f32 %v3674_v1, %v4165_v20  ;;  %v655_v6 = vpop.f32.mrb[7].mxu0  ;;  %v3574_v7 = vpack.c.bf16 %v725_v62, %v725_v62  ;;  %v728_v9 = vadd.f32 %v3690_v5, %v4165_v20  ;;  %v719_v11 = vpop.f32.mrb[7].mxu1 }
 0x10a   : > { %v3556_v8 = vpack.c.bf16 %v653_v63, %v653_v63  ;;  %v656_v10 = vadd.f32 %v655_v6, %v4165_v20  ;;  %v3572_v12 = vpack.c.bf16 %v717_v3, %v717_v3  ;;  %v720_v14 = vadd.f32 %v719_v11, %v4165_v20 }
 0x10b   : > { %897 = vst.msk [vmem:[#allocation2 + $0x58] sm:$0xf] %vm308_vm7, %v3558_v2  ;;  %v3559_v13 = vpack.c.bf16 %v664_v4, %v664_v4  ;;  %913 = vst.msk [vmem:[#allocation2 + $0xf8] sm:$0xf] %vm308_vm7, %v3574_v7  ;;  %v3575_v15 = vpack.c.bf16 %v728_v9, %v728_v9 }
 0x10c   : > { %895 = vst.msk [vmem:[#allocation2 + $0x44] sm:$0xf] %vm308_vm7, %v3556_v8  ;;  %v3557_v16 = vpack.c.bf16 %v656_v10, %v656_v10  ;;  %911 = vst.msk [vmem:[#allocation2 + $0xe4] sm:$0xf] %vm308_vm7, %v3572_v12  ;;  %v3573_v17 = vpack.c.bf16 %v720_v14, %v720_v14 }
 0x10d   : > { %898 = vst.msk [vmem:[#allocation2 + $0x5c] sm:$0xf] %vm308_vm7, %v3559_v13  ;;  %914 = vst.msk [vmem:[#allocation2 + $0xfc] sm:$0xf] %vm308_vm7, %v3575_v15 }
 0x10e   : > { %896 = vst.msk [vmem:[#allocation2 + $0x48] sm:$0xf] %vm308_vm7, %v3557_v16  ;;  %v3677_v18 = vpop.f32.mrb[8].mxu0  ;;  %912 = vst.msk [vmem:[#allocation2 + $0xe8] sm:$0xf] %vm308_vm7, %v3573_v17  ;;  %v3693_v21 = vpop.f32.mrb[8].mxu1 }
 0x10f   : > { %v677_v19 = vadd.f32 %v3677_v18, %v4165_v20  ;;  %v668_v22 = vpop.f32.mrb[9].mxu0  ;;  %v741_v25 = vadd.f32 %v3693_v21, %v4165_v20  ;;  %v732_v27 = vpop.f32.mrb[9].mxu1 }
 0x110   : > { %v669_v26 = vadd.f32 %v668_v22, %v4165_v20  ;;  %v3678_v28 = vpop.f32.mrb[10].mxu0  ;;  %v733_v30 = vadd.f32 %v732_v27, %v4165_v20  ;;  %v3694_v32 = vpop.f32.mrb[10].mxu1 }
 0x111   : > { %v3562_v29 = vpack.c.bf16 %v677_v19, %v677_v19  ;;  %v680_v31 = vadd.f32 %v3678_v28, %v4165_v20  ;;  %v671_v33 = vpop.f32.mrb[11].mxu0  ;;  %v3578_v34 = vpack.c.bf16 %v741_v25, %v741_v25  ;;  %v744_v36 = vadd.f32 %v3694_v32, %v4165_v20  ;;  %v735_v38 = vpop.f32.mrb[11].mxu1 }
 0x112   : > { %v3560_v35 = vpack.c.bf16 %v669_v26, %v669_v26  ;;  %v672_v37 = vadd.f32 %v671_v33, %v4165_v20  ;;  %v3576_v39 = vpack.c.bf16 %v733_v30, %v733_v30  ;;  %v736_v41 = vadd.f32 %v735_v38, %v4165_v20 }
 0x113   : > { %901 = vst.msk [vmem:[#allocation2 + $0x80] sm:$0xf] %vm308_vm7, %v3562_v29  ;;  %v3563_v40 = vpack.c.bf16 %v680_v31, %v680_v31  ;;  %917 = vst.msk [vmem:[#allocation2 + $0x120] sm:$0xf] %vm308_vm7, %v3578_v34  ;;  %v3579_v42 = vpack.c.bf16 %v744_v36, %v744_v36 }
 0x114   : > { %899 = vst.msk [vmem:[#allocation2 + $0x6c] sm:$0xf] %vm308_vm7, %v3560_v35  ;;  %v3561_v43 = vpack.c.bf16 %v672_v37, %v672_v37  ;;  %915 = vst.msk [vmem:[#allocation2 + $0x10c] sm:$0xf] %vm308_vm7, %v3576_v39  ;;  %v3577_v44 = vpack.c.bf16 %v736_v41, %v736_v41 }
 0x115   : > { %902 = vst.msk [vmem:[#allocation2 + $0x84] sm:$0xf] %vm308_vm7, %v3563_v40  ;;  %918 = vst.msk [vmem:[#allocation2 + $0x124] sm:$0xf] %vm308_vm7, %v3579_v42 }
 0x116   : > { %900 = vst.msk [vmem:[#allocation2 + $0x70] sm:$0xf] %vm308_vm7, %v3561_v43  ;;  %v3681_v45 = vpop.f32.mrb[12].mxu0  ;;  %916 = vst.msk [vmem:[#allocation2 + $0x110] sm:$0xf] %vm308_vm7, %v3577_v44  ;;  %v3697_v24 = vpop.f32.mrb[12].mxu1 }
 0x117   : > { %v693_v23 = vadd.f32 %v3681_v45, %v4165_v20  ;;  %v684_v46 = vpop.f32.mrb[13].mxu0  ;;  %v757_v47 = vadd.f32 %v3697_v24, %v4165_v20  ;;  %v748_v49 = vpop.f32.mrb[13].mxu1 }
 0x118   : > { %v685_v48 = vadd.f32 %v684_v46, %v4165_v20  ;;  %v3682_v50 = vpop.f32.mrb[14].mxu0  ;;  %v749_v52 = vadd.f32 %v748_v49, %v4165_v20  ;;  %v3698_v54 = vpop.f32.mrb[14].mxu1 }
 0x119   : > { %v3566_v51 = vpack.c.bf16 %v693_v23, %v693_v23  ;;  %v696_v53 = vadd.f32 %v3682_v50, %v4165_v20  ;;  %v687_v55 = vpop.f32.mrb[15].mxu0  ;;  %v3582_v56 = vpack.c.bf16 %v757_v47, %v757_v47  ;;  %v760_v58 = vadd.f32 %v3698_v54, %v4165_v20  ;;  %v751_v60 = vpop.f32.mrb[15].mxu1 }
 0x11a   : > { %v3564_v57 = vpack.c.bf16 %v685_v48, %v685_v48  ;;  %v688_v59 = vadd.f32 %v687_v55, %v4165_v20  ;;  %v3580_v61 = vpack.c.bf16 %v749_v52, %v749_v52  ;;  %v752_v63 = vadd.f32 %v751_v60, %v4165_v20 }
 0x11b   : > { %905 = vst.msk [vmem:[#allocation2 + $0xa8] sm:$0xf] %vm308_vm7, %v3566_v51  ;;  %v3567_v62 = vpack.c.bf16 %v696_v53, %v696_v53  ;;  %921 = vst.msk [vmem:[#allocation2 + $0x148] sm:$0xf] %vm308_vm7, %v3582_v56  ;;  %v3583_v0 = vpack.c.bf16 %v760_v58, %v760_v58 }
 0x11c   : > { %903 = vst.msk [vmem:[#allocation2 + $0x94] sm:$0xf] %vm308_vm7, %v3564_v57  ;;  %v3565_v1 = vpack.c.bf16 %v688_v59, %v688_v59  ;;  %919 = vst.msk [vmem:[#allocation2 + $0x134] sm:$0xf] %vm308_vm7, %v3580_v61  ;;  %v3581_v2 = vpack.c.bf16 %v752_v63, %v752_v63 }
 0x11d   : > { %906 = vst.msk [vmem:[#allocation2 + $0xac] sm:$0xf] %vm308_vm7, %v3567_v62  ;;  %922 = vst.msk [vmem:[#allocation2 + $0x14c] sm:$0xf] %vm308_vm7, %v3583_v0 }
 0x11e   : > { %904 = vst.msk [vmem:[#allocation2 + $0x98] sm:$0xf] %vm308_vm7, %v3565_v1  ;;  %920 = vst.msk [vmem:[#allocation2 + $0x138] sm:$0xf] %vm308_vm7, %v3581_v2 }
 0x11f PF: > { %s3584_s9 = smul.u32 160, %s3973_s27  ;;  %vm951_vm9 = vsmask.f32 256  ;;  %vm952_vm10 = vsmask.f32 4368  ;;  %s5397_s17 = smov 8  }
 0x120   : > { %vm1138_vm11 = vsmask.f32 3328  ;;  %vm1139_vm12 = vsmask.f32 7440  ;;  %s5389_s18 = smov 32   ;;  %vm4402_vm13 = vmor %vm951_vm9, %vm952_vm10  ;;  %s5393_s22 = smov 24  }
 0x121   : > { %s4351_s10 = scalar_lea.vmem [#allocation2], %s3584_s9  ;;  %vm4416_vm14 = vmor %vm1138_vm11, %vm1139_vm12  ;;  %s5395_s23 = smov 16   ;;  %vm2293_vm15 = vcmask 64512   ;;  %vm2318_vm0 = vcmask 130048   ;;  %vm2335_vm1 = vcmask 195584   ;;  %vm2352_vm2 = vcmask 261120  }
 0x122   : > { %s5387_s9 = smov 40   ;;  %s5385_s20 = smov 48   ;;  %vm2369_vm3 = vcmask 326656   ;;  %vm2386_vm4 = vcmask 392192   ;;  %vm2403_vm5 = vcmask 457728   ;;  %vm2497_vm6 = vcmask 1043456  }
 0x123   : > { %s5391_s16 = smov 56   ;;  %s5428_s0 = smov 64   ;;  %vm2420_vm7 = vcmask 523264   ;;  %vm2480_vm8 = vcmask 588800   ;;  %vm3153_vm9 = vcmask 31744   ;;  %vm3156_vm10 = vcmask 97280  }
 0x124   : > { %s4005_s2 = smov 36   ;;  %vm3159_vm11 = vcmask 162816   ;;  %vm3162_vm12 = vcmask 228352  }
 0x125   : > { %v928_v20 = vld [vmem:[%s4351_s10 + $0x8] sm:$0xf]  ;;  %v929_v3 = vld [vmem:[%s4351_s10 + $0xc] sm:$0xf]  ;;  %v3369_v4 = vld [vmem:[%s4351_s10 + $0x30] sm:$0xf] }
 0x126   : > { %v969_v5 = vshrl.u32 %v929_v3, 16  ;;  %v972_v6 = vshll.u32 %v929_v3, 16  ;;  %v3455_v7 = vcombine.low %v928_v20, %v929_v3  ;;  %v960_v8 = vshrl.u32 %v928_v20, 16  ;;  %v4357_v9 = vld [vmem:[%s4351_s10 + $0x34] sm:$0xf] }
 0x127   : > { %v963_v10 = vshll.u32 %v928_v20, 16  ;;  %v1318_v11 = vshrl.u32 %v4357_v9, 16  ;;  %v1321_v12 = vshll.u32 %v4357_v9, 16  ;;  %v3480_v13 = vcombine.low %v3369_v4, %v4357_v9  ;;  %v931_v14 = vld [vmem:[%s4351_s10 + $0x1c] sm:$0xf] }
 0x128   : > { %v971_v15 = vrot.slane %v969_v5, 7  ;;  %v4363_v16 = vrot.slane %v972_v6, 5  ;;  %v1147_v17 = vrot.slane %v969_v5, 4  ;;  %1965 = vrot.lane.b32.xlu0 %v3455_v7, %s5397_s17  ;;  %v4366_v18 = vrot.slane %v960_v8, 7  ;;  %v4369_v19 = vld [vmem:[%s4351_s10 + $0x20] sm:$0xf] }
 0x129   : > { %v1141_v21 = vrot.slane %v960_v8, 4  ;;  %v1142_v22 = vrot.slane %v963_v10, 5  ;;  %v4371_v25 = vrot.slane %v1318_v11, 4  ;;  %2103 = vrot.lane.b32.xlu1 %v3480_v13, %s5389_s18  ;;  %v1309_v26 = vshrl.u32 %v3369_v4, 16  ;;  %v3368_v27 = vld [vmem:[%s4351_s10 + $0x2c] sm:$0x8] }
 0x12a   : > { %v4375_v28 = vor.u32 %v972_v6, %v971_v15  ;;  %v4378_v29 = vor.u32 %v963_v10, %v4366_v18  ;;  %v1312_v31 = vshll.u32 %v3369_v4, 16  ;;  %v982_v33 = vshrl.u32 %v931_v14, 16  ;;  %v3366_v36 = vld [vmem:[%s4351_s10 + $0x1c] sm:$0xf]  ;;  %v3367_v41 = vld [vmem:[%s4351_s10 + $0x20] sm:$0xf] }
 0x12b   : > { %v4381_v32 = vrot.slane %v1309_v26, 4  ;;  %v985_v34 = vshll.u32 %v931_v14, 16  ;;  %v991_v35 = vshrl.u32 %v4369_v19, 16  ;;  %v994_v38 = vshll.u32 %v4369_v19, 16  ;;  %v1130_v23 = vld [vmem:[%s4351_s10 + $0x10] sm:$0x1] }
 0x12c   : > { %v4385_v37 = vrot.slane %v1312_v31, 5  ;;  %v3456_v39 = vcombine.low %v931_v14, %v4369_v19  ;;  %v1304_v40 = vshrl.u32 %v3368_v27, 16  ;;  %v4390_v42 = vrot.slane %v982_v33, 7  ;;  %v3365_v49 = vld [vmem:[%s4351_s10 + $0x18] sm:$0x8] }
 0x12d   : > { %v993_v43 = vrot.slane %v991_v35, 7  ;;  %v1155_v44 = vrot.slane %v982_v33, 4  ;;  %v1156_v45 = vrot.slane %v985_v34, 5  ;;  %v1161_v24 = vrot.slane %v991_v35, 4  ;;  %v1131_v7 = vld [vmem:[%s4351_s10 + $0x24] sm:$0x1] }
 0x12e   : > { %1967 = vrot.lane.b32.xlu0 %v3456_v39, %s5397_s17  ;;  %v3390_v46 = vrot.slane %v1304_v40, 11  ;;  %v1311_v47 = vrot.slane %v1309_v26, 7  ;;  %v1320_v48 = vrot.slane %v1318_v11, 7  ;;  %v4396_v50 = vor.u32 %v985_v34, %v4390_v42 }
 0x12f   : > { %v4398_v51 = vor.u32 %v994_v38, %v993_v43  ;;  %v1287_v53 = vshrl.u32 %v3366_v36, 16  ;;  %v1296_v54 = vshrl.u32 %v3367_v41, 16  ;;  %v3479_v58 = vcombine.low %v3366_v36, %v3367_v41 }
 0x130   : > { %v1314_v55 = vor.u32 %v1312_v31, %v1311_v47  ;;  %v1316_v56 = vrot.slane %v1311_v47, 4  ;;  %v1323_v57 = vor.u32 %v1321_v12, %v1320_v48  ;;  %v1143_v59 = vor.u32 %v1142_v22, %v1141_v21  ;;  %v3397_v31 = vld [vmem:[%s4351_s10 + $0x24] sm:$0x1] }
 0x131   : > { %v1148_v60 = vor.u32 %v1147_v17, %v4363_v16  ;;  %v1151_v61 = vshll.u32 %v1130_v23, 16  ;;  %v1282_v62 = vshrl.u32 %v3365_v49, 16  ;;  %v1289_v2 = vrot.slane %v1287_v53, 7  ;;  %v3398_v23 = vld [vmem:[%s4351_s10 + $0x38] sm:$0x1] }
 0x132   : > { %v1315_v63 = vsel %vm4402_vm13, %v3390_v46, %v1314_v55  ;;  %v1324_v0 = vsel %vm4402_vm13, %v1316_v56, %v1323_v57  ;;  %2101 = vrot.lane.b32.xlu0 %v3479_v58, %s5389_s18  ;;  %v1290_v20 = vshll.u32 %v3366_v36, 16  ;;  %v1144_v4 = vrot.slane %v1143_v59, 4  ;;  %v3407_v46 = vld [vmem:[%s4351_s10 + $0x2c] sm:$0x8]  ;;  %v4442_v57 = vld [vmem:[%s4351_s10 + $0x30] sm:$0xf] }
 0x133   : > { %v3472_v3 = vcombine.low %v1315_v63, %v1324_v0  ;;  %v1149_v5 = vrot.slane %v1148_v60, 4  ;;  %v1153_v6 = vrot.slane %v1151_v61, 5  ;;  %v3389_v8 = vrot.slane %v1282_v62, 11  ;;  %v4448_v61 = vld [vmem:[%s4351_s10 + $0x34] sm:$0xf]  ;;  %s5399_s18 = smov 64  }
 0x134   : > { %v1292_v10 = vor.u32 %v1290_v20, %v1289_v2  ;;  %v1294_v11 = vrot.slane %v1289_v2, 4  ;;  %v1298_v13 = vrot.slane %v1296_v54, 7  ;;  %v1146_v14 = vsel %vm4416_vm14, %v1144_v4, %v4363_v16  ;;  %v3410_v63 = vld [vmem:[%s4351_s10 + $0x40] sm:$0x8]  ;;  %v4455_v0 = vld [vmem:[%s4351_s10 + $0x44] sm:$0xf] }
 0x135   : > { %2047 = vrot.lane.b32.xlu1 %v3472_v3, %s5393_s22  ;;  %v1154_v15 = vsel %vm4416_vm14, %v1149_v5, %v1153_v6  ;;  %v1299_v17 = vshll.u32 %v3367_v41, 16  ;;  %v1157_v19 = vor.u32 %v1156_v45, %v1155_v44  ;;  %v1159_v26 = vrot.slane %v994_v38, 5  ;;  %v4463_v5 = vld [vmem:[%s4351_s10 + $0x48] sm:$0xf] }
 0x136   : > { %v3463_v21 = vcombine.low %v1146_v14, %v1154_v15  ;;  %v1293_v22 = vsel %vm4402_vm13, %v3389_v8, %v1292_v10  ;;  %v1165_v27 = vshll.u32 %v1131_v7, 16  ;;  %v1465_v35 = vrot.slane %v1287_v53, 4 }
 0x137   : > { %v1301_v33 = vor.u32 %v1299_v17, %v1298_v13  ;;  %v1158_v34 = vrot.slane %v1157_v19, 4  ;;  %v1466_v36 = vrot.slane %v1290_v20, 5  ;;  %v1162_v39 = vor.u32 %v1161_v24, %v1159_v26 }
 0x138   : > { %v1167_v16 = vrot.slane %v1165_v27, 5  ;;  %v1469_v40 = vrot.slane %v1299_v17, 5  ;;  %v1471_v43 = vrot.slane %v1296_v54, 4  ;;  %v1475_v45 = vshll.u32 %v3397_v31, 16 }
 0x139   : > { %2005 = vrot.lane.b32.xlu1 %v3463_v21, %s5395_s23  ;;  %v1302_v41 = vsel %vm4402_vm13, %v1294_v11, %v1301_v33  ;;  %v1160_v38 = vsel %vm4416_vm14, %v1158_v34, %v1159_v26  ;;  %v1467_v44 = vor.u32 %v1466_v36, %v1465_v35  ;;  %v1163_v24 = vrot.slane %v1162_v39, 4 }
 0x13a   : > { %v3471_v47 = vcombine.low %v1293_v22, %v1302_v41  ;;  %v1472_v48 = vor.u32 %v1471_v43, %v1469_v40  ;;  %v1481_v49 = vor.u32 %v4385_v37, %v4381_v32  ;;  %v1477_v54 = vrot.slane %v1475_v45, 5  ;;  %v3439_v43 = vld [vmem:[%s4351_s10 + $0x38] sm:$0x1]  ;;  %v4485_v41 = vld [vmem:[%s4351_s10 + $0x30] sm:$0xf] }
 0x13b   : > { %v1468_v53 = vrot.slane %v1467_v44, 4  ;;  %v1483_v55 = vrot.slane %v1321_v12, 5  ;;  %v1489_v56 = vshll.u32 %v3398_v23, 16  ;;  %v1168_v58 = vsel %vm4416_vm14, %v1163_v24, %v1167_v16 }
 0x13c   : > { %2045 = vrot.lane.b32.xlu0 %v3471_v47, %s5393_s22  ;;  %v1473_v59 = vrot.slane %v1472_v48, 4  ;;  %v1482_v60 = vrot.slane %v1481_v49, 4  ;;  %v1606_v32 = vshrl.u32 %v3407_v46, 16  ;;  %v3464_v37 = vcombine.low %v1160_v38, %v1168_v58  ;;  %s5422_s22 = smov 48  }
 0x13d   : > { %v1470_v62 = vsel %vm4416_vm14, %v1468_v53, %v1469_v40  ;;  %v1486_v9 = vor.u32 %v4371_v25, %v1483_v55  ;;  %v1491_v12 = vrot.slane %v1489_v56, 5  ;;  %v1611_v4 = vshrl.u32 %v4442_v57, 16  ;;  %v4490_v53 = vld [vmem:[%s4351_s10 + $0x34] sm:$0xf] }
 0x13e   : > { %v1478_v2 = vsel %vm4416_vm14, %v1473_v59, %v1477_v54  ;;  %v1484_v20 = vsel %vm4416_vm14, %v1482_v60, %v1483_v55  ;;  %v3431_v3 = vrot.slane %v1606_v32, 11  ;;  %2007 = vrot.lane.b32.xlu1 %v3464_v37, %s5395_s23  ;;  %v1614_v25 = vshll.u32 %v4442_v57, 16 }
 0x13f   : > { %v3487_v6 = vcombine.low %v1470_v62, %v1478_v2  ;;  %v1487_v7 = vrot.slane %v1486_v9, 4  ;;  %v1620_v8 = vshrl.u32 %v4448_v61, 16  ;;  %v1613_v10 = vrot.slane %v1611_v4, 7 }
 0x140   : > { %v1623_v11 = vshll.u32 %v4448_v61, 16  ;;  %v1628_v13 = vshrl.u32 %v3410_v63, 16  ;;  %v1633_v14 = vshrl.u32 %v4455_v0, 16  ;;  %v1636_v19 = vshll.u32 %v4455_v0, 16 }
 0x141   : > { %2141 = vrot.lane.b32.xlu0 %v3487_v6, %s5387_s9  ;;  %v1492_v15 = vsel %vm4416_vm14, %v1487_v7, %v1491_v12  ;;  %v1622_v17 = vrot.slane %v1620_v8, 7  ;;  %v1642_v21 = vshrl.u32 %v4463_v5, 16  ;;  %v1616_v26 = vor.u32 %v1614_v25, %v1613_v10  ;;  %v3440_v6 = vld [vmem:[%s4351_s10 + $0x4c] sm:$0x1]  ;;  %v937_v7 = vld [vmem:[%s4351_s10 + $0x44] sm:$0xf] }
 0x142   : > { %v3488_v22 = vcombine.low %v1484_v20, %v1492_v15  ;;  %v1618_v27 = vrot.slane %v1613_v10, 4  ;;  %v3432_v31 = vrot.slane %v1628_v13, 11  ;;  %v1635_v34 = vrot.slane %v1633_v14, 7  ;;  %v938_v13 = vld [vmem:[%s4351_s10 + $0x48] sm:$0xf] }
 0x143   : > { %v1625_v33 = vor.u32 %v1623_v11, %v1622_v17  ;;  %v1644_v35 = vrot.slane %v1642_v21, 7  ;;  %v1645_v36 = vshll.u32 %v4463_v5, 16  ;;  %v1617_v39 = vsel %vm4402_vm13, %v3431_v3, %v1616_v26 }
 0x144   : > { %2143 = vrot.lane.b32.xlu1 %v3488_v22, %s5387_s9  ;;  %v3503_v16 = vcombine.low %v4442_v57, %v4448_v61  ;;  %v3504_v40 = vcombine.low %v4455_v0, %v4463_v5  ;;  %v1789_v23 = vrot.slane %v1611_v4, 4  ;;  %v1638_v44 = vor.u32 %v1636_v19, %v1635_v34  ;;  %s5420_s9 = smov 32  }
 0x145   : > { %v1626_v38 = vsel %vm4402_vm13, %v1618_v27, %v1625_v33  ;;  %v1640_v45 = vrot.slane %v1635_v34, 4  ;;  %v1647_v46 = vor.u32 %v1645_v36, %v1644_v35  ;;  %v1790_v24 = vrot.slane %v1614_v25, 5  ;;  %v3878_v35 = vld [vmem:[%s5379_s3] sm:$0xff]  }
 0x146   : > { %v3495_v47 = vcombine.low %v1617_v39, %v1626_v38  ;;  %v1793_v48 = vrot.slane %v1623_v11, 5  ;;  %v1795_v49 = vrot.slane %v1620_v8, 4  ;;  %v1639_v54 = vsel %vm4402_vm13, %v3432_v31, %v1638_v44  ;;  %3699 = vmatprep.subr.bf16.mxu0 %v3878_v35 }
 0x147   : > { %v1648_v55 = vsel %vm4402_vm13, %v1640_v45, %v1647_v46  ;;  %v1799_v56 = vshll.u32 %v3439_v43, 16  ;;  %v1004_v57 = vshrl.u32 %v4485_v41, 16  ;;  %v1791_v59 = vor.u32 %v1790_v24, %v1789_v23  ;;  %v1132_v23 = vld [vmem:[%s4351_s10 + $0x38] sm:$0x1]  ;;  %3700 = vmatpush3.bf16.msra.mxu0 %v3878_v35 }
 0x148   : > { %2181 = vrot.lane.b32.xlu0 %v3495_v47, %s5385_s20  ;;  %v3496_v58 = vcombine.low %v1639_v54, %v1648_v55  ;;  %v1796_v60 = vor.u32 %v1795_v49, %v1793_v48  ;;  %v1007_v61 = vshll.u32 %v4485_v41, 16  ;;  %v1013_v62 = vshrl.u32 %v4490_v53, 16  ;;  %v1133_v49 = vld [vmem:[%s4351_s10 + $0x4c] sm:$0x1] }
 0x149   : > { %v1801_v32 = vrot.slane %v1799_v56, 5  ;;  %v4499_v37 = vrot.slane %v1004_v57, 7  ;;  %v1016_v9 = vshll.u32 %v4490_v53, 16  ;;  %v1792_v12 = vrot.slane %v1791_v59, 4  ;;  %v3879_v54 = vld [vmem:[%s5379_s3 + $0x8] sm:$0xff]  }
 0x14a   : > { %2183 = vrot.lane.b32.xlu1 %v3496_v58, %s5385_s20  ;;  %v1797_v63 = vrot.slane %v1796_v60, 4  ;;  %v1169_v0 = vrot.slane %v1004_v57, 4  ;;  %v1170_v2 = vrot.slane %v1007_v61, 5  ;;  %v1015_v3 = vrot.slane %v1013_v62, 7  ;;  %v4545_v59 = vld [vmem:[%s4351_s10 + $0x44] sm:$0xf]  ;;  %3701 = vmatprep.subr.bf16.mxu0 %v3879_v54 }
 0x14b   : > { %v4505_v20 = vor.u32 %v1007_v61, %v4499_v37  ;;  %v4507_v4 = vrot.slane %v1013_v62, 4  ;;  %v3457_v5 = vcombine.low %v4485_v41, %v4490_v53  ;;  %v1794_v25 = vsel %vm4416_vm14, %v1792_v12, %v1793_v48  ;;  %v3371_v53 = vld [vmem:[%s4351_s10 + $0x40] sm:$0x8]  ;;  %v3880_v60 = vld [vmem:[%s5379_s3 + $0x10] sm:$0xff]   ;;  %3702 = vmatpush3.bf16.msra.mxu0 %v3879_v54  ;;  %s5419_s20 = smov 24  }
 0x14c   : > { %2237 = vrot.lane.b32.xlu0 %v3503_v16, %s5391_s16  ;;  %v1802_v8 = vsel %vm4416_vm14, %v1797_v63, %v1801_v32  ;;  %v1803_v10 = vrot.slane %v1633_v14, 4  ;;  %v1804_v11 = vrot.slane %v1636_v19, 5  ;;  %v4519_v17 = vor.u32 %v1016_v9, %v1015_v3  ;;  %3703 = vmatprep.subr.bf16.mxu0 %v3880_v60 }
 0x14d   : > { %v3511_v15 = vcombine.low %v1794_v25, %v1802_v8  ;;  %v1807_v22 = vrot.slane %v1645_v36, 5  ;;  %v1809_v26 = vrot.slane %v1642_v21, 4  ;;  %v1813_v31 = vshll.u32 %v3440_v6, 16  ;;  %v3374_v25 = vld [vmem:[%s4351_s10 + $0x54] sm:$0x8] }
 0x14e   : > { %2239 = vrot.lane.b32.xlu1 %v3504_v40, %s5391_s16  ;;  %v1805_v27 = vor.u32 %v1804_v11, %v1803_v10  ;;  %v1026_v33 = vshrl.u32 %v937_v7, 16  ;;  %v1029_v34 = vshll.u32 %v937_v7, 16  ;;  %v1035_v14 = vshrl.u32 %v938_v13, 16  ;;  %v4561_v8 = vld [vmem:[%s4351_s10 + $0x58] sm:$0xf]  ;;  %s5421_s16 = smov 40  }
 0x14f   : > { %v1810_v39 = vor.u32 %v1809_v26, %v1807_v22  ;;  %v1038_v19 = vshll.u32 %v938_v13, 16  ;;  %v3458_v16 = vcombine.low %v937_v7, %v938_v13  ;;  %v1815_v21 = vrot.slane %v1813_v31, 5  ;;  %3704 = vmatpush3.bf16.msra.mxu0 %v3880_v60 }
 0x150   : > { %2277 = vrot.lane.b32.xlu0 %v3511_v15, %s5399_s18  ;;  %v1806_v36 = vrot.slane %v1805_v27, 4  ;;  %v4526_v40 = vrot.slane %v1026_v33, 7  ;;  %v1183_v43 = vrot.slane %v1026_v33, 4  ;;  %v1037_v38 = vrot.slane %v1035_v14, 7 }
 0x151   : > { %v1811_v41 = vrot.slane %v1810_v39, 4  ;;  %v1184_v44 = vrot.slane %v1029_v34, 5  ;;  %v1189_v45 = vrot.slane %v1035_v14, 4  ;;  %v1171_v24 = vor.u32 %v1170_v2, %v1169_v0  ;;  %v4552_v2 = vld [vmem:[%s4351_s10 + $0x48] sm:$0xf] }
 0x152   : > { %1969 = vrot.lane.b32.xlu1 %v3457_v5, %s5397_s17  ;;  %v1808_v46 = vsel %vm4416_vm14, %v1806_v36, %v1807_v22  ;;  %v4533_v47 = vor.u32 %v1029_v34, %v4526_v40  ;;  %v1173_v48 = vrot.slane %v1016_v9, 5  ;;  %v4542_v56 = vor.u32 %v1038_v19, %v1037_v38  ;;  %v3881_v22 = vld [vmem:[%s5379_s3 + $0x18] sm:$0xff]  }
 0x153   : > { %v1816_v55 = vsel %vm4416_vm14, %v1811_v41, %v1815_v21  ;;  %v1179_v57 = vshll.u32 %v1132_v23, 16  ;;  %v1185_v58 = vor.u32 %v1184_v44, %v1183_v43  ;;  %v1172_v32 = vrot.slane %v1171_v24, 4  ;;  %v4574_v39 = vld [vmem:[%s4351_s10 + $0x5c] sm:$0xf]  ;;  %3705 = vmatprep.subr.bf16.mxu0 %v3881_v22 }
 0x154   : > { %v3512_v61 = vcombine.low %v1808_v46, %v1816_v55  ;;  %v1176_v62 = vor.u32 %v4507_v4, %v1173_v48  ;;  %v1187_v9 = vrot.slane %v1038_v19, 5  ;;  %v1193_v0 = vshll.u32 %v1133_v49, 16  ;;  %3706 = vmatpush3.bf16.msra.mxu0 %v3881_v22 }
 0x155   : > { %v1181_v12 = vrot.slane %v1179_v57, 5  ;;  %v1186_v63 = vrot.slane %v1185_v58, 4  ;;  %v1326_v3 = vshrl.u32 %v3371_v53, 16  ;;  %v1174_v5 = vsel %vm4416_vm14, %v1172_v32, %v1173_v48  ;;  %v3399_v57 = vld [vmem:[%s4351_s10 + $0x4c] sm:$0x1] }
 0x156   : > { %2279 = vrot.lane.b32.xlu0 %v3512_v61, %s5399_s18  ;;  %1971 = vrot.lane.b32.xlu1 %v3458_v16, %s5397_s17  ;;  %v1177_v6 = vrot.slane %v1176_v62, 4  ;;  %v1190_v7 = vor.u32 %v1189_v45, %v1187_v9  ;;  %v1331_v4 = vshrl.u32 %v4545_v59, 16  ;;  %v1195_v11 = vrot.slane %v1193_v0, 5  ;;  %v3413_v0 = vld [vmem:[%s4351_s10 + $0x54] sm:$0x8] }
 0x157   : > { %v1188_v10 = vsel %vm4416_vm14, %v1186_v63, %v1187_v9  ;;  %v3391_v13 = vrot.slane %v1326_v3, 11  ;;  %v1334_v15 = vshll.u32 %v4545_v59, 16  ;;  %v1340_v33 = vshrl.u32 %v4552_v2, 16 }
 0x158   : > { %v1182_v26 = vsel %vm4416_vm14, %v1177_v6, %v1181_v12  ;;  %v1191_v27 = vrot.slane %v1190_v7, 4  ;;  %v1333_v31 = vrot.slane %v1331_v4, 7  ;;  %v1343_v35 = vshll.u32 %v4552_v2, 16  ;;  %v4598_v7 = vld [vmem:[%s4351_s10 + $0x58] sm:$0xf] }
 0x159   : > { %v3465_v34 = vcombine.low %v1174_v5, %v1182_v26  ;;  %v1348_v14 = vshrl.u32 %v3374_v25, 16  ;;  %v1353_v19 = vshrl.u32 %v4561_v8, 16  ;;  %v1342_v43 = vrot.slane %v1340_v33, 7 }
 0x15a   : > { %v1196_v16 = vsel %vm4416_vm14, %v1191_v27, %v1195_v11  ;;  %v1336_v36 = vor.u32 %v1334_v15, %v1333_v31  ;;  %v1338_v21 = vrot.slane %v1333_v31, 4  ;;  %v1356_v44 = vshll.u32 %v4561_v8, 16  ;;  %v4602_v11 = vld [vmem:[%s4351_s10 + $0x5c] sm:$0xf]  ;;  %v3416_v27 = vld [vmem:[%s4351_s10 + $0x68] sm:$0x8] }
 0x15b   : > { %2009 = vrot.lane.b32.xlu0 %v3465_v34, %s5395_s23  ;;  %v3466_v23 = vcombine.low %v1188_v10, %v1196_v16  ;;  %v3392_v41 = vrot.slane %v1348_v14, 11  ;;  %v1355_v38 = vrot.slane %v1353_v19, 7  ;;  %v1345_v46 = vor.u32 %v1343_v35, %v1342_v43 }
 0x15c   : > { %v1337_v45 = vsel %vm4402_vm13, %v3391_v13, %v1336_v36  ;;  %v1362_v24 = vshrl.u32 %v4574_v39, 16  ;;  %v1365_v48 = vshll.u32 %v4574_v39, 16  ;;  %v3481_v54 = vcombine.low %v4545_v59, %v4552_v2  ;;  %v3400_v59 = vld [vmem:[%s4351_s10 + $0x60] sm:$0x1]  ;;  %v4611_v36 = vld [vmem:[%s4351_s10 + $0x6c] sm:$0xf] }
 0x15d   : > { %2011 = vrot.lane.b32.xlu1 %v3466_v23, %s5395_s23  ;;  %v1358_v49 = vor.u32 %v1356_v44, %v1355_v38  ;;  %v1360_v53 = vrot.slane %v1355_v38, 4  ;;  %v3482_v55 = vcombine.low %v4561_v8, %v4574_v39  ;;  %v1346_v58 = vsel %vm4402_vm13, %v1338_v21, %v1345_v46  ;;  %s5423_s23 = smov 56  }
 0x15e   : > { %v1364_v60 = vrot.slane %v1362_v24, 7  ;;  %v1493_v61 = vrot.slane %v1331_v4, 4  ;;  %v1494_v32 = vrot.slane %v1334_v15, 5  ;;  %v3473_v62 = vcombine.low %v1337_v45, %v1346_v58 }
 0x15f   : > { %v1359_v9 = vsel %vm4402_vm13, %v3392_v41, %v1358_v49  ;;  %v1497_v12 = vrot.slane %v1343_v35, 5  ;;  %v1499_v63 = vrot.slane %v1340_v33, 4  ;;  %v1503_v5 = vshll.u32 %v3399_v57, 16 }
 0x160   : > { %v1367_v2 = vor.u32 %v1365_v48, %v1364_v60  ;;  %v1495_v3 = vor.u32 %v1494_v32, %v1493_v61  ;;  %v1507_v6 = vrot.slane %v1353_v19, 4  ;;  %2049 = vrot.lane.b32.xlu0 %v3473_v62, %s5419_s20  ;;  %v1508_v25 = vrot.slane %v1356_v44, 5 }
 0x161   : > { %v1500_v4 = vor.u32 %v1499_v63, %v1497_v12  ;;  %v1511_v8 = vrot.slane %v1365_v48, 5  ;;  %v1513_v10 = vrot.slane %v1362_v24, 4  ;;  %v1505_v22 = vrot.slane %v1503_v5, 5  ;;  %v4620_v24 = vld [vmem:[%s4351_s10 + $0x70] sm:$0xf] }
 0x162   : > { %v1368_v13 = vsel %vm4402_vm13, %v1360_v53, %v1367_v2  ;;  %v1496_v15 = vrot.slane %v1495_v3, 4  ;;  %v1517_v26 = vshll.u32 %v3400_v59, 16  ;;  %v1509_v34 = vor.u32 %v1508_v25, %v1507_v6  ;;  %v4641_v25 = vld [vmem:[%s4351_s10 + $0x58] sm:$0xf] }
 0x163   : > { %v3474_v31 = vcombine.low %v1359_v9, %v1368_v13  ;;  %v1501_v33 = vrot.slane %v1500_v4, 4  ;;  %v1514_v35 = vor.u32 %v1513_v10, %v1511_v8  ;;  %v1650_v19 = vshrl.u32 %v3413_v0, 16 }
 0x164   : > { %v1498_v39 = vsel %vm4416_vm14, %v1496_v15, %v1497_v12  ;;  %v1519_v14 = vrot.slane %v1517_v26, 5  ;;  %v1655_v16 = vshrl.u32 %v4598_v7, 16  ;;  %2105 = vrot.lane.b32.xlu0 %v3481_v54, %s5420_s9  ;;  %v1510_v43 = vrot.slane %v1509_v34, 4 }
 0x165   : > { %2051 = vrot.lane.b32.xlu1 %v3474_v31, %s5419_s20  ;;  %v1506_v21 = vsel %vm4416_vm14, %v1501_v33, %v1505_v22  ;;  %v1515_v23 = vrot.slane %v1514_v35, 4  ;;  %v1658_v41 = vshll.u32 %v4598_v7, 16  ;;  %v3433_v44 = vrot.slane %v1650_v19, 11  ;;  %v4646_v22 = vld [vmem:[%s4351_s10 + $0x5c] sm:$0xf] }
 0x166   : > { %v3489_v38 = vcombine.low %v1498_v39, %v1506_v21  ;;  %v1657_v45 = vrot.slane %v1655_v16, 7  ;;  %v1664_v46 = vshrl.u32 %v4602_v11, 16  ;;  %v1512_v48 = vsel %vm4416_vm14, %v1510_v43, %v1511_v8 }
 0x167   : > { %v1520_v49 = vsel %vm4416_vm14, %v1515_v23, %v1519_v14  ;;  %v1667_v53 = vshll.u32 %v4602_v11, 16  ;;  %v1672_v54 = vshrl.u32 %v3416_v27, 16  ;;  %v1677_v62 = vshrl.u32 %v4611_v36, 16 }
 0x168   : > { %v3490_v57 = vcombine.low %v1512_v48, %v1520_v49  ;;  %v1660_v58 = vor.u32 %v1658_v41, %v1657_v45  ;;  %v1662_v60 = vrot.slane %v1657_v45, 4  ;;  %v1666_v61 = vrot.slane %v1664_v46, 7  ;;  %2145 = vrot.lane.b32.xlu0 %v3489_v38, %s5421_s16 }
 0x169   : > { %2107 = vrot.lane.b32.xlu1 %v3482_v55, %s5420_s9  ;;  %v3434_v32 = vrot.slane %v1672_v54, 11  ;;  %v1680_v9 = vshll.u32 %v4611_v36, 16  ;;  %v1686_v12 = vshrl.u32 %v4620_v24, 16  ;;  %v1689_v0 = vshll.u32 %v4620_v24, 16  ;;  %v3441_v55 = vld [vmem:[%s4351_s10 + $0x60] sm:$0x1] }
 0x16a   : > { %v1661_v63 = vsel %vm4402_vm13, %v3433_v44, %v1660_v58  ;;  %v1669_v59 = vor.u32 %v1667_v53, %v1666_v61  ;;  %v3505_v2 = vcombine.low %v4598_v7, %v4602_v11  ;;  %v1679_v3 = vrot.slane %v1677_v62, 7  ;;  %v943_v54 = vld [vmem:[%s4351_s10 + $0x6c] sm:$0xf] }
 0x16b   : > { %v1688_v5 = vrot.slane %v1686_v12, 7  ;;  %v3506_v6 = vcombine.low %v4611_v36, %v4620_v24  ;;  %v1817_v4 = vrot.slane %v1655_v16, 4  ;;  %v1818_v10 = vrot.slane %v1658_v41, 5 }
 0x16c   : > { %v1670_v8 = vsel %vm4402_vm13, %v1662_v60, %v1669_v59  ;;  %v1821_v13 = vrot.slane %v1667_v53, 5  ;;  %v1823_v15 = vrot.slane %v1664_v46, 4  ;;  %v1682_v11 = vor.u32 %v1680_v9, %v1679_v3  ;;  %v3442_v46 = vld [vmem:[%s4351_s10 + $0x74] sm:$0x1] }
 0x16d   : > { %2147 = vrot.lane.b32.xlu1 %v3490_v57, %s5421_s16  ;;  %v3497_v7 = vcombine.low %v1661_v63, %v1670_v8  ;;  %v1684_v26 = vrot.slane %v1679_v3, 4  ;;  %v1691_v27 = vor.u32 %v1689_v0, %v1688_v5  ;;  %v1819_v31 = vor.u32 %v1818_v10, %v1817_v4  ;;  %v944_v57 = vld [vmem:[%s4351_s10 + $0x70] sm:$0xf] }
 0x16e   : > { %v1824_v33 = vor.u32 %v1823_v15, %v1821_v13  ;;  %v1827_v34 = vshll.u32 %v3441_v55, 16  ;;  %v1048_v35 = vshrl.u32 %v4641_v25, 16  ;;  %v1683_v39 = vsel %vm4402_vm13, %v3434_v32, %v1682_v11 }
 0x16f   : > { %2185 = vrot.lane.b32.xlu0 %v3497_v7, %s5422_s22  ;;  %v1692_v14 = vsel %vm4402_vm13, %v1684_v26, %v1691_v27  ;;  %v1051_v19 = vshll.u32 %v4641_v25, 16  ;;  %v1057_v16 = vshrl.u32 %v4646_v22, 16  ;;  %v1820_v21 = vrot.slane %v1819_v31, 4 }
 0x170   : > { %v3498_v36 = vcombine.low %v1683_v39, %v1692_v14  ;;  %v1825_v43 = vrot.slane %v1824_v33, 4  ;;  %v1829_v23 = vrot.slane %v1827_v34, 5  ;;  %v4657_v41 = vrot.slane %v1048_v35, 7  ;;  %v3377_v39 = vld [vmem:[%s4351_s10 + $0x68] sm:$0x8] }
 0x171   : > { %v1059_v38 = vrot.slane %v1057_v16, 7  ;;  %v1060_v44 = vshll.u32 %v4646_v22, 16  ;;  %v1197_v45 = vrot.slane %v1048_v35, 4  ;;  %v1822_v24 = vsel %vm4416_vm14, %v1820_v21, %v1821_v13  ;;  %v1135_v35 = vld [vmem:[%s4351_s10 + $0x74] sm:$0x1] }
 0x172   : > { %2187 = vrot.lane.b32.xlu1 %v3498_v36, %s5422_s22  ;;  %v1830_v48 = vsel %vm4416_vm14, %v1825_v43, %v1829_v23  ;;  %v1198_v49 = vrot.slane %v1051_v19, 5  ;;  %v1203_v53 = vrot.slane %v1057_v16, 4  ;;  %v4670_v60 = vor.u32 %v1051_v19, %v4657_v41  ;;  %v4694_v21 = vld [vmem:[%s4351_s10 + $0x6c] sm:$0xf] }
 0x173   : > { %2241 = vrot.lane.b32.xlu0 %v3505_v2, %s5423_s23  ;;  %v3513_v58 = vcombine.low %v1822_v24, %v1830_v48  ;;  %v4672_v61 = vor.u32 %v1060_v44, %v1059_v38  ;;  %v3459_v32 = vcombine.low %v4641_v25, %v4646_v22  ;;  %v1831_v63 = vrot.slane %v1677_v62, 4  ;;  %v4697_v48 = vld [vmem:[%s4351_s10 + $0x70] sm:$0xf] }
 0x174   : > { %v1832_v59 = vrot.slane %v1680_v9, 5  ;;  %v1835_v55 = vrot.slane %v1689_v0, 5  ;;  %v1837_v3 = vrot.slane %v1686_v12, 4  ;;  %v1841_v5 = vshll.u32 %v3442_v46, 16  ;;  %v1134_v12 = vld [vmem:[%s4351_s10 + $0x60] sm:$0x1] }
 0x175   : > { %v1070_v4 = vshrl.u32 %v943_v54, 16  ;;  %v1073_v8 = vshll.u32 %v943_v54, 16  ;;  %v1079_v10 = vshrl.u32 %v944_v57, 16  ;;  %v1082_v15 = vshll.u32 %v944_v57, 16 }
 0x176   : > { %2243 = vrot.lane.b32.xlu1 %v3506_v6, %s5423_s23  ;;  %v1833_v2 = vor.u32 %v1832_v59, %v1831_v63  ;;  %v1838_v13 = vor.u32 %v1837_v3, %v1835_v55  ;;  %v3460_v7 = vcombine.low %v943_v54, %v944_v57  ;;  %v1843_v25 = vrot.slane %v1841_v5, 5  ;;  %v3380_v63 = vld [vmem:[%s4351_s10 + $0x7c] sm:$0x8]  ;;  %v4705_v59 = vld [vmem:[%s4351_s10 + $0x80] sm:$0xf] }
 0x177   : > { %2281 = vrot.lane.b32.xlu0 %v3513_v58, %s5399_s18  ;;  %v4678_v62 = vrot.slane %v1070_v4, 7  ;;  %v1081_v9 = vrot.slane %v1079_v10, 7  ;;  %v1211_v0 = vrot.slane %v1070_v4, 4  ;;  %v1212_v26 = vrot.slane %v1073_v8, 5 }
 0x178   : > { %v1834_v22 = vrot.slane %v1833_v2, 4  ;;  %v1839_v11 = vrot.slane %v1838_v13, 4  ;;  %v1217_v27 = vrot.slane %v1079_v10, 4  ;;  %v1199_v33 = vor.u32 %v1198_v49, %v1197_v45 }
 0x179   : > { %v4682_v6 = vor.u32 %v1073_v8, %v4678_v62  ;;  %v4684_v31 = vor.u32 %v1082_v15, %v1081_v9  ;;  %v1201_v34 = vrot.slane %v1060_v44, 5  ;;  %v1207_v16 = vshll.u32 %v1134_v12, 16 }
 0x17a   : > { %1973 = vrot.lane.b32.xlu1 %v3459_v32, %s5397_s17  ;;  %v1836_v14 = vsel %vm4416_vm14, %v1834_v22, %v1835_v55  ;;  %v1844_v19 = vsel %vm4416_vm14, %v1839_v11, %v1843_v25  ;;  %v1213_v36 = vor.u32 %v1212_v26, %v1211_v0  ;;  %v1200_v23 = vrot.slane %v1199_v33, 4  ;;  %v4716_v25 = vld [vmem:[%s4351_s10 + $0x84] sm:$0xf] }
 0x17b   : > { %v3514_v43 = vcombine.low %v1836_v14, %v1844_v19  ;;  %v1204_v38 = vor.u32 %v1203_v53, %v1201_v34  ;;  %v1215_v44 = vrot.slane %v1082_v15, 5  ;;  %v1209_v45 = vrot.slane %v1207_v16, 5 }
 0x17c   : > { %v1214_v46 = vrot.slane %v1213_v36, 4  ;;  %v1221_v24 = vshll.u32 %v1135_v35, 16  ;;  %v1370_v49 = vshrl.u32 %v3377_v39, 16  ;;  %v1202_v54 = vsel %vm4416_vm14, %v1200_v23, %v1201_v34 }
 0x17d   : > { %2283 = vrot.lane.b32.xlu0 %v3514_v43, %s5399_s18  ;;  %v1205_v57 = vrot.slane %v1204_v38, 4  ;;  %v1218_v58 = vor.u32 %v1217_v27, %v1215_v44  ;;  %v1375_v32 = vshrl.u32 %v4694_v21, 16  ;;  %v1378_v5 = vshll.u32 %v4694_v21, 16  ;;  %v3401_v38 = vld [vmem:[%s4351_s10 + $0x74] sm:$0x1] }
 0x17e   : > { %1975 = vrot.lane.b32.xlu1 %v3460_v7, %s5397_s17  ;;  %v1216_v53 = vsel %vm4416_vm14, %v1214_v46, %v1215_v44  ;;  %v1223_v55 = vrot.slane %v1221_v24, 5  ;;  %v3393_v3 = vrot.slane %v1370_v49, 11  ;;  %v1384_v2 = vshrl.u32 %v4697_v48, 16  ;;  %s5424_s17 = smov 16  }
 0x17f   : > { %v1210_v4 = vsel %vm4416_vm14, %v1205_v57, %v1209_v45  ;;  %v1219_v8 = vrot.slane %v1218_v58, 4  ;;  %v1377_v10 = vrot.slane %v1375_v32, 7  ;;  %v1387_v15 = vshll.u32 %v4697_v48, 16 }
 0x180   : > { %v3467_v13 = vcombine.low %v1202_v54, %v1210_v4  ;;  %v1392_v7 = vshrl.u32 %v3380_v63, 16  ;;  %v1397_v9 = vshrl.u32 %v4705_v59, 16  ;;  %v1386_v11 = vrot.slane %v1384_v2, 7  ;;  %v3402_v63 = vld [vmem:[%s4351_s10 + $0x88] sm:$0x1] }
 0x181   : > { %v1224_v0 = vsel %vm4416_vm14, %v1219_v8, %v1223_v55  ;;  %v1380_v12 = vor.u32 %v1378_v5, %v1377_v10  ;;  %v1382_v22 = vrot.slane %v1377_v10, 4  ;;  %v1400_v34 = vshll.u32 %v4705_v59, 16  ;;  %v4741_v8 = vld [vmem:[%s4351_s10 + $0x80] sm:$0xf] }
 0x182   : > { %2013 = vrot.lane.b32.xlu0 %v3467_v13, %s5424_s17  ;;  %v3468_v26 = vcombine.low %v1216_v53, %v1224_v0  ;;  %v3394_v27 = vrot.slane %v1392_v7, 11  ;;  %v1399_v33 = vrot.slane %v1397_v9, 7  ;;  %v1389_v39 = vor.u32 %v1387_v15, %v1386_v11 }
 0x183   : > { %v1381_v35 = vsel %vm4402_vm13, %v3393_v3, %v1380_v12  ;;  %v1406_v14 = vshrl.u32 %v4716_v25, 16  ;;  %v1409_v19 = vshll.u32 %v4716_v25, 16  ;;  %v3483_v43 = vcombine.low %v4694_v21, %v4697_v48  ;;  %v4746_v12 = vld [vmem:[%s4351_s10 + $0x84] sm:$0xf] }
 0x184   : > { %2015 = vrot.lane.b32.xlu1 %v3468_v26, %s5424_s17  ;;  %v1402_v16 = vor.u32 %v1400_v34, %v1399_v33  ;;  %v1404_v36 = vrot.slane %v1399_v33, 4  ;;  %v3484_v23 = vcombine.low %v4705_v59, %v4716_v25  ;;  %v1390_v44 = vsel %vm4402_vm13, %v1382_v22, %v1389_v39  ;;  %v3419_v59 = vld [vmem:[%s4351_s10 + $0x7c] sm:$0x8]  ;;  %v3422_v33 = vld [vmem:[%s4351_s10 + $0x90] sm:$0x8] }
 0x185   : > { %v1408_v45 = vrot.slane %v1406_v14, 7  ;;  %v1521_v46 = vrot.slane %v1375_v32, 4  ;;  %v1522_v24 = vrot.slane %v1378_v5, 5  ;;  %v3475_v49 = vcombine.low %v1381_v35, %v1390_v44 }
 0x186   : > { %v1403_v54 = vsel %vm4402_vm13, %v3394_v27, %v1402_v16  ;;  %v1525_v57 = vrot.slane %v1387_v15, 5  ;;  %v1527_v58 = vrot.slane %v1384_v2, 4  ;;  %v1531_v53 = vshll.u32 %v3401_v38, 16 }
 0x187   : > { %v1411_v21 = vor.u32 %v1409_v19, %v1408_v45  ;;  %v1523_v48 = vor.u32 %v1522_v24, %v1521_v46  ;;  %v1535_v55 = vrot.slane %v1397_v9, 4  ;;  %2053 = vrot.lane.b32.xlu0 %v3475_v49, %s5419_s20  ;;  %v1536_v4 = vrot.slane %v1400_v34, 5  ;;  %v4762_v45 = vld [vmem:[%s4351_s10 + $0x98] sm:$0xf] }
 0x188   : > { %v1528_v3 = vor.u32 %v1527_v58, %v1525_v57  ;;  %v1539_v32 = vrot.slane %v1409_v19, 5  ;;  %v1541_v5 = vrot.slane %v1406_v14, 4  ;;  %v1533_v13 = vrot.slane %v1531_v53, 5  ;;  %v4758_v19 = vld [vmem:[%s4351_s10 + $0x94] sm:$0xf] }
 0x189   : > { %v1412_v10 = vsel %vm4402_vm13, %v1404_v36, %v1411_v21  ;;  %v1524_v2 = vrot.slane %v1523_v48, 4  ;;  %v1545_v15 = vshll.u32 %v3402_v63, 16  ;;  %v1537_v9 = vor.u32 %v1536_v4, %v1535_v55 }
 0x18a   : > { %v3476_v25 = vcombine.low %v1403_v54, %v1412_v10  ;;  %v1529_v7 = vrot.slane %v1528_v3, 4  ;;  %v1542_v0 = vor.u32 %v1541_v5, %v1539_v32  ;;  %v1694_v26 = vshrl.u32 %v3419_v59, 16 }
 0x18b   : > { %v1526_v22 = vsel %vm4416_vm14, %v1524_v2, %v1525_v57  ;;  %v1547_v11 = vrot.slane %v1545_v15, 5  ;;  %v1699_v27 = vshrl.u32 %v4741_v8, 16  ;;  %2109 = vrot.lane.b32.xlu0 %v3483_v43, %s5420_s9  ;;  %v1538_v35 = vrot.slane %v1537_v9, 4  ;;  %v4783_v15 = vld [vmem:[%s4351_s10 + $0x80] sm:$0xf] }
 0x18c   : > { %2055 = vrot.lane.b32.xlu1 %v3476_v25, %s5419_s20  ;;  %v1534_v34 = vsel %vm4416_vm14, %v1529_v7, %v1533_v13  ;;  %v1543_v39 = vrot.slane %v1542_v0, 4  ;;  %v1702_v14 = vshll.u32 %v4741_v8, 16  ;;  %v3435_v36 = vrot.slane %v1694_v26, 11 }
 0x18d   : > { %v3491_v16 = vcombine.low %v1526_v22, %v1534_v34  ;;  %v1701_v38 = vrot.slane %v1699_v27, 7  ;;  %v1708_v44 = vshrl.u32 %v4746_v12, 16  ;;  %v1540_v46 = vsel %vm4416_vm14, %v1538_v35, %v1539_v32  ;;  %v4788_v22 = vld [vmem:[%s4351_s10 + $0x84] sm:$0xf] }
 0x18e   : > { %v1548_v43 = vsel %vm4416_vm14, %v1543_v39, %v1547_v11  ;;  %v1711_v24 = vshll.u32 %v4746_v12, 16  ;;  %v1716_v49 = vshrl.u32 %v3422_v33, 16  ;;  %v1721_v48 = vshrl.u32 %v4758_v19, 16 }
 0x18f   : > { %v3492_v54 = vcombine.low %v1540_v46, %v1548_v43  ;;  %v1704_v57 = vor.u32 %v1702_v14, %v1701_v38  ;;  %v1706_v58 = vrot.slane %v1701_v38, 4  ;;  %v1710_v63 = vrot.slane %v1708_v44, 7  ;;  %2149 = vrot.lane.b32.xlu0 %v3491_v16, %s5421_s16 }
 0x190   : > { %2111 = vrot.lane.b32.xlu1 %v3484_v23, %s5420_s9  ;;  %v3436_v21 = vrot.slane %v1716_v49, 11  ;;  %v1724_v53 = vshll.u32 %v4758_v19, 16  ;;  %v1730_v55 = vshrl.u32 %v4762_v45, 16  ;;  %v1733_v4 = vshll.u32 %v4762_v45, 16  ;;  %v3443_v23 = vld [vmem:[%s4351_s10 + $0x88] sm:$0x1] }
 0x191   : > { %v1705_v59 = vsel %vm4402_vm13, %v3435_v36, %v1704_v57  ;;  %v1713_v3 = vor.u32 %v1711_v24, %v1710_v63  ;;  %v3507_v32 = vcombine.low %v4741_v8, %v4746_v12  ;;  %v1723_v5 = vrot.slane %v1721_v48, 7 }
 0x192   : > { %v1732_v10 = vrot.slane %v1730_v55, 7  ;;  %v3508_v2 = vcombine.low %v4758_v19, %v4762_v45  ;;  %v1845_v13 = vrot.slane %v1699_v27, 4  ;;  %v1846_v7 = vrot.slane %v1702_v14, 5 }
 0x193   : > { %v1714_v25 = vsel %vm4402_vm13, %v1706_v58, %v1713_v3  ;;  %v1849_v9 = vrot.slane %v1711_v24, 5  ;;  %v1851_v0 = vrot.slane %v1708_v44, 4  ;;  %v1726_v12 = vor.u32 %v1724_v53, %v1723_v5  ;;  %v950_v3 = vld [vmem:[%s4351_s10 + $0x98] sm:$0xf] }
 0x194   : > { %2151 = vrot.lane.b32.xlu1 %v3492_v54, %s5421_s16  ;;  %v3499_v8 = vcombine.low %v1705_v59, %v1714_v25  ;;  %v1728_v11 = vrot.slane %v1723_v5, 4  ;;  %v1735_v26 = vor.u32 %v1733_v4, %v1732_v10  ;;  %v1847_v33 = vor.u32 %v1846_v7, %v1845_v13  ;;  %v3444_v54 = vld [vmem:[%s4351_s10 + $0x9c] sm:$0x1]  ;;  %v949_v59 = vld [vmem:[%s4351_s10 + $0x94] sm:$0xf] }
 0x195   : > { %v1852_v34 = vor.u32 %v1851_v0, %v1849_v9  ;;  %v1855_v27 = vshll.u32 %v3443_v23, 16  ;;  %v1092_v35 = vshrl.u32 %v4783_v15, 16  ;;  %v1727_v39 = vsel %vm4402_vm13, %v3436_v21, %v1726_v12 }
 0x196   : > { %2189 = vrot.lane.b32.xlu0 %v3499_v8, %s5422_s22  ;;  %v1736_v14 = vsel %vm4402_vm13, %v1728_v11, %v1735_v26  ;;  %v1095_v19 = vshll.u32 %v4783_v15, 16  ;;  %v1101_v16 = vshrl.u32 %v4788_v22, 16  ;;  %v1848_v38 = vrot.slane %v1847_v33, 4 }
 0x197   : > { %v3500_v36 = vcombine.low %v1727_v39, %v1736_v14  ;;  %v1853_v44 = vrot.slane %v1852_v34, 4  ;;  %v1857_v45 = vrot.slane %v1855_v27, 5  ;;  %v4799_v46 = vrot.slane %v1092_v35, 7 }
 0x198   : > { %v1103_v43 = vrot.slane %v1101_v16, 7  ;;  %v1104_v24 = vshll.u32 %v4788_v22, 16  ;;  %v1225_v49 = vrot.slane %v1092_v35, 4  ;;  %v1850_v57 = vsel %vm4416_vm14, %v1848_v38, %v1849_v9 }
 0x199   : > { %2191 = vrot.lane.b32.xlu1 %v3500_v36, %s5422_s22  ;;  %v1858_v58 = vsel %vm4416_vm14, %v1853_v44, %v1857_v45  ;;  %v1226_v63 = vrot.slane %v1095_v19, 5  ;;  %v1231_v21 = vrot.slane %v1101_v16, 4  ;;  %v4812_v5 = vor.u32 %v1095_v19, %v4799_v46  ;;  %v1137_v44 = vld [vmem:[%s4351_s10 + $0x9c] sm:$0x1]  ;;  %v3383_v45 = vld [vmem:[%s4351_s10 + $0x90] sm:$0x8] }
 0x19a   : > { %2245 = vrot.lane.b32.xlu0 %v3507_v32, %s5423_s23  ;;  %v3515_v23 = vcombine.low %v1850_v57, %v1858_v58  ;;  %v4814_v10 = vor.u32 %v1104_v24, %v1103_v43  ;;  %v3461_v13 = vcombine.low %v4783_v15, %v4788_v22  ;;  %v1859_v25 = vrot.slane %v1721_v48, 4  ;;  %v4818_v33 = vpop.permute.xlu0 %1965  ;;  %v1136_v15 = vld [vmem:[%s4351_s10 + $0x88] sm:$0x1] }
 0x19b   : > { %v1860_v7 = vrot.slane %v1724_v53, 5  ;;  %v1863_v9 = vrot.slane %v1733_v4, 5  ;;  %v1865_v0 = vrot.slane %v1730_v55, 4  ;;  %v1869_v8 = vshll.u32 %v3444_v54, 16 }
 0x19c   : > { %v1114_v12 = vshrl.u32 %v949_v59, 16  ;;  %v1117_v11 = vshll.u32 %v949_v59, 16  ;;  %v1123_v26 = vshrl.u32 %v950_v3, 16  ;;  %v1126_v27 = vshll.u32 %v950_v3, 16 }
 0x19d   : > { %2247 = vrot.lane.b32.xlu1 %v3508_v2, %s5423_s23  ;;  %v1861_v32 = vor.u32 %v1860_v7, %v1859_v25  ;;  %v1866_v34 = vor.u32 %v1865_v0, %v1863_v9  ;;  %v3462_v35 = vcombine.low %v949_v59, %v950_v3  ;;  %v1871_v48 = vrot.slane %v1869_v8, 5  ;;  %v4838_v59 = vld [vmem:[%s4351_s10 + $0x94] sm:$0xf]  ;;  %v4840_v3 = vpop.permute.xlu1 %2103  ;;  %v4845_v0 = vld [vmem:[%s4351_s10 + $0x98] sm:$0xf] }
 0x19e   : > { %2285 = vrot.lane.b32.xlu0 %v3515_v23, %s5399_s18  ;;  %v4822_v53 = vrot.slane %v1114_v12, 7  ;;  %v1125_v55 = vrot.slane %v1123_v26, 7  ;;  %v1239_v4 = vrot.slane %v1114_v12, 4  ;;  %v1240_v14 = vrot.slane %v1117_v11, 5  ;;  %s5425_s18 = smov 8   ;;  %5426 = vst [vmem:[#allocation6_spill] sm:$0xff] %v4838_v59 }
 0x19f   : > { %v1862_v22 = vrot.slane %v1861_v32, 4  ;;  %v1867_v39 = vrot.slane %v1866_v34, 4  ;;  %v1245_v19 = vrot.slane %v1123_v26, 4  ;;  %v1227_v36 = vor.u32 %v1226_v63, %v1225_v49  ;;  %5427 = vst [vmem:[#allocation7_spill] sm:$0xff] %v4845_v0  ;;  %v4853_v34 = vld [vmem:[%s4351_s10 + $0xa8] sm:$0xf] }
 0x1a0   : > { %v4826_v2 = vor.u32 %v1117_v11, %v4822_v53  ;;  %v4828_v16 = vor.u32 %v1126_v27, %v1125_v55  ;;  %v1229_v38 = vrot.slane %v1104_v24, 5  ;;  %v1235_v57 = vshll.u32 %v1136_v15, 16  ;;  %v4842_v25 = vpop.permute.xlu0 %1967 }
 0x1a1   : > { %1977 = vrot.lane.b32.xlu1 %v3461_v13, %s5425_s18  ;;  %v1864_v43 = vsel %vm4416_vm14, %v1862_v22, %v1863_v9  ;;  %v1872_v54 = vsel %vm4416_vm14, %v1867_v39, %v1871_v48  ;;  %v1241_v58 = vor.u32 %v1240_v14, %v1239_v4  ;;  %v1228_v24 = vrot.slane %v1227_v36, 4 }
 0x1a2   : > { %v3516_v49 = vcombine.low %v1864_v43, %v1872_v54  ;;  %v1232_v63 = vor.u32 %v1231_v21, %v1229_v38  ;;  %v1243_v23 = vrot.slane %v1126_v27, 5  ;;  %v1237_v13 = vrot.slane %v1235_v57, 5  ;;  %v3386_v21 = vld [vmem:[%s4351_s10 + $0xa4] sm:$0x8] }
 0x1a3   : > { %v1242_v7 = vrot.slane %v1241_v58, 4  ;;  %v1249_v9 = vshll.u32 %v1137_v44, 16  ;;  %v1414_v8 = vshrl.u32 %v3383_v45, 16  ;;  %v1230_v12 = vsel %vm4416_vm14, %v1228_v24, %v1229_v38  ;;  %v4864_v38 = vld [vmem:[%s4351_s10 + $0xac] sm:$0xf] }
 0x1a4   : > { %2287 = vrot.lane.b32.xlu0 %v3516_v49, %s5428_s0  ;;  %v1233_v11 = vrot.slane %v1232_v63, 4  ;;  %v1246_v26 = vor.u32 %v1245_v19, %v1243_v23  ;;  %v1419_v32 = vshrl.u32 %v4838_v59, 16  ;;  %v1422_v4 = vshll.u32 %v4838_v59, 16  ;;  %v4871_v49 = vpop.permute.xlu0 %2101 }
 0x1a5   : > { %1979 = vrot.lane.b32.xlu1 %v3462_v35, %s5425_s18  ;;  %v1244_v27 = vsel %vm4416_vm14, %v1242_v7, %v1243_v23  ;;  %v1251_v48 = vrot.slane %v1249_v9, 5  ;;  %v3395_v55 = vrot.slane %v1414_v8, 11  ;;  %v1428_v14 = vshrl.u32 %v4845_v0, 16 }
 0x1a6   : > { %v1238_v15 = vsel %vm4416_vm14, %v1233_v11, %v1237_v13  ;;  %v1247_v22 = vrot.slane %v1246_v26, 4  ;;  %v1421_v39 = vrot.slane %v1419_v32, 7  ;;  %v1431_v36 = vshll.u32 %v4845_v0, 16 }
 0x1a7   : > { %v3469_v19 = vcombine.low %v1230_v12, %v1238_v15  ;;  %v1436_v35 = vshrl.u32 %v3386_v21, 16  ;;  %v1441_v44 = vshrl.u32 %v4853_v34, 16  ;;  %v4867_v45 = vpop.permute.xlu1 %2047  ;;  %v1430_v58 = vrot.slane %v1428_v14, 7 }
 0x1a8   : > { %v1252_v43 = vsel %vm4416_vm14, %v1247_v22, %v1251_v48  ;;  %v1424_v54 = vor.u32 %v1422_v4, %v1421_v39  ;;  %v1426_v57 = vrot.slane %v1421_v39, 4  ;;  %v1444_v13 = vshll.u32 %v4853_v34, 16  ;;  %v3403_v48 = vld [vmem:[%s4351_s10 + $0x9c] sm:$0x1] }
 0x1a9   : > { %2017 = vrot.lane.b32.xlu0 %v3469_v19, %s5424_s17  ;;  %v3470_v24 = vcombine.low %v1244_v27, %v1252_v43  ;;  %v3396_v63 = vrot.slane %v1436_v35, 11  ;;  %v1443_v23 = vrot.slane %v1441_v44, 7  ;;  %v1433_v9 = vor.u32 %v1431_v36, %v1430_v58  ;;  %v927_v35 = vld [vmem:[%s4351_s10 + $0x4] sm:$0x8] }
 0x1aa   : > { %v1425_v7 = vsel %vm4402_vm13, %v3395_v55, %v1424_v54  ;;  %v1450_v8 = vshrl.u32 %v4864_v38, 16  ;;  %v1453_v12 = vshll.u32 %v4864_v38, 16  ;;  %v3485_v21 = vcombine.low %v4838_v59, %v4845_v0 }
 0x1ab   : > { %2019 = vrot.lane.b32.xlu1 %v3470_v24, %s5424_s17  ;;  %v1446_v11 = vor.u32 %v1444_v13, %v1443_v23  ;;  %v1448_v26 = vrot.slane %v1443_v23, 4  ;;  %v3486_v27 = vcombine.low %v4853_v34, %v4864_v38  ;;  %v4885_v15 = vpop.permute.xlu1 %2005  ;;  %v1434_v55 = vsel %vm4402_vm13, %v1426_v57, %v1433_v9 }
 0x1ac   : > { %v1452_v22 = vrot.slane %v1450_v8, 7  ;;  %v1549_v39 = vrot.slane %v1419_v32, 4  ;;  %v1550_v19 = vrot.slane %v1422_v4, 5  ;;  %v3477_v43 = vcombine.low %v1425_v7, %v1434_v55 }
 0x1ad   : > { %v1447_v54 = vsel %vm4402_vm13, %v3396_v63, %v1446_v11  ;;  %v1553_v58 = vrot.slane %v1431_v36, 5  ;;  %v1555_v24 = vrot.slane %v1428_v14, 4  ;;  %v1559_v0 = vshll.u32 %v3403_v48, 16  ;;  %v3404_v63 = vld [vmem:[%s4351_s10 + $0xb0] sm:$0x1] }
 0x1ae   : > { %v1455_v23 = vor.u32 %v1453_v12, %v1452_v22  ;;  %v1551_v30 = vor.u32 %v1550_v19, %v1549_v39  ;;  %v4892_v59 = vpop.permute.xlu0 %2045  ;;  %2057 = vrot.lane.b32.xlu0 %v3477_v43, %s5419_s20  ;;  %v955_v57 = vshrl.u32 %v927_v35, 16  ;;  %v5429_v4 = vrot.slane %v4366_v18, 4  ;;  %v3425_v14 = vld [vmem:[%s4351_s10 + $0xa4] sm:$0x8]  ;;  %v4905_v22 = vld [vmem:[%s4351_s10 + $0xa8] sm:$0xf] }
 0x1af   : > { %v1556_v32 = vor.u32 %v1555_v24, %v1553_v58  ;;  %v1563_v36 = vrot.slane %v1441_v44, 4  ;;  %v1561_v48 = vrot.slane %v1559_v0, 5  ;;  %v1564_v55 = vrot.slane %v1444_v13, 5  ;;  %v4919_v13 = vld [vmem:[%s4351_s10 + $0xac] sm:$0xf] }
 0x1b0   : > { %v975_v7 = vsel %vm4402_vm13, %v5429_v4, %v4375_v28  ;;  %v1456_v9 = vsel %vm4402_vm13, %v1448_v26, %v1455_v23  ;;  %v1552_v11 = vrot.slane %v1551_v30, 4  ;;  %v3355_v35 = vrot.slane %v955_v57, 11  ;;  %v4907_v18 = vpop.permute.xlu1 %2007 }
 0x1b1   : > { %v3478_v39 = vcombine.low %v1447_v54, %v1456_v9  ;;  %v1557_v19 = vrot.slane %v1556_v32, 4  ;;  %v1567_v43 = vrot.slane %v1453_v12, 5  ;;  %v1565_v44 = vor.u32 %v1564_v55, %v1563_v36  ;;  %v930_v32 = vld [vmem:[%s4351_s10 + $0x18] sm:$0x8]  ;;  %v4933_v55 = vld [vmem:[%s4351_s10 + $0xbc] sm:$0xf] }
 0x1b2   : > { %v1554_v28 = vsel %vm4416_vm14, %v1552_v11, %v1553_v58  ;;  %v1569_v24 = vrot.slane %v1450_v8, 4  ;;  %v1573_v4 = vshll.u32 %v3404_v63, 16  ;;  %2113 = vrot.lane.b32.xlu0 %v3485_v21, %s5420_s9  ;;  %v966_v0 = vsel %vm4402_vm13, %v3355_v35, %v4378_v29  ;;  %v3428_v11 = vld [vmem:[%s4351_s10 + $0xb8] sm:$0x8] }
 0x1b3   : > { %2059 = vrot.lane.b32.xlu1 %v3478_v39, %s5419_s20  ;;  %v1562_v30 = vsel %vm4416_vm14, %v1557_v19, %v1561_v48  ;;  %v1738_v12 = vshrl.u32 %v3425_v14, 16  ;;  %v1743_v26 = vshrl.u32 %v4905_v22, 16  ;;  %v3447_v54 = vcombine.low %v966_v0, %v975_v7  ;;  %v4923_v21 = vpop.permute.xlu0 %2141 }
 0x1b4   : > { %v3493_v8 = vcombine.low %v1554_v28, %v1562_v30  ;;  %v1566_v58 = vrot.slane %v1565_v44, 4  ;;  %v1570_v23 = vor.u32 %v1569_v24, %v1567_v43  ;;  %v1575_v57 = vrot.slane %v1573_v4, 5  ;;  %v4944_v4 = vld [vmem:[%s4351_s10 + $0xc0] sm:$0xf] }
 0x1b5   : > { %v3437_v63 = vrot.slane %v1738_v12, 11  ;;  %v1745_v36 = vrot.slane %v1743_v26, 7  ;;  %v1746_v9 = vshll.u32 %v4905_v22, 16  ;;  %v2296_v29 = vsel %vm2293_vm15, %v3447_v54, %v4818_v33 }
 0x1b6   : > { %v1568_v14 = vsel %vm4416_vm14, %v1566_v58, %v1567_v43  ;;  %v1571_v48 = vrot.slane %v1570_v23, 4  ;;  %v1752_v7 = vshrl.u32 %v4919_v13, 16  ;;  %v4935_v39 = vpop.permute.xlu1 %2143  ;;  %2153 = vrot.lane.b32.xlu0 %v3493_v8, %s5421_s16  ;;  %v1755_v28 = vshll.u32 %v4919_v13, 16 }
 0x1b7   : > { %2115 = vrot.lane.b32.xlu1 %v3486_v27, %s5420_s9  ;;  %v1748_v19 = vor.u32 %v1746_v9, %v1745_v36  ;;  %v1750_v35 = vrot.slane %v1745_v36, 4  ;;  %v977_v44 = vshrl.u32 %v930_v32, 16  ;;  %v989_v24 = vrot.slane %v4390_v42, 4 }
 0x1b8   : > { %v1576_v33 = vsel %vm4416_vm14, %v1571_v48, %v1575_v57  ;;  %v1754_v43 = vrot.slane %v1752_v7, 7  ;;  %v1760_v30 = vshrl.u32 %v3428_v11, 16  ;;  %v1765_v8 = vshrl.u32 %v4933_v55, 16 }
 0x1b9   : > { %v3494_v0 = vcombine.low %v1568_v14, %v1576_v33  ;;  %v1749_v27 = vsel %vm4402_vm13, %v3437_v63, %v1748_v19  ;;  %v3356_v12 = vrot.slane %v977_v44, 11  ;;  %v997_v58 = vsel %vm4402_vm13, %v989_v24, %v4398_v51  ;;  %v3445_v44 = vld [vmem:[%s4351_s10 + $0xb0] sm:$0x1] }
 0x1ba   : > { %v1757_v54 = vor.u32 %v1755_v28, %v1754_v43  ;;  %v3438_v23 = vrot.slane %v1760_v30, 11  ;;  %v1768_v32 = vshll.u32 %v4933_v55, 16  ;;  %v4953_v42 = vpop.permute.xlu0 %2181  ;;  %v1767_v63 = vrot.slane %v1765_v8, 7 }
 0x1bb   : > { %2155 = vrot.lane.b32.xlu1 %v3494_v0, %s5421_s16  ;;  %v988_v57 = vsel %vm4402_vm13, %v3356_v12, %v4396_v50  ;;  %v1774_v36 = vshrl.u32 %v4944_v4, 16  ;;  %v1777_v11 = vshll.u32 %v4944_v4, 16  ;;  %v3509_v48 = vcombine.low %v4905_v22, %v4919_v13 }
 0x1bc   : > { %v1758_v14 = vsel %vm4402_vm13, %v1750_v35, %v1757_v54  ;;  %v3448_v51 = vcombine.low %v988_v57, %v997_v58  ;;  %v3510_v19 = vcombine.low %v4933_v55, %v4944_v4  ;;  %v4968_v33 = vpop.permute.xlu1 %2183  ;;  %v1770_v50 = vor.u32 %v1768_v32, %v1767_v63  ;;  %v3446_v57 = vld [vmem:[%s4351_s10 + $0xc4] sm:$0x1] }
 0x1bd   : > { %v3501_v43 = vcombine.low %v1749_v27, %v1758_v14  ;;  %v1772_v24 = vrot.slane %v1767_v63, 4  ;;  %v1776_v30 = vrot.slane %v1774_v36, 7  ;;  %v1873_v12 = vrot.slane %v1743_v26, 4 }
 0x1be   : > { %v2299_v0 = vsel %vm2293_vm15, %v3448_v51, %v4842_v25  ;;  %v1874_v35 = vrot.slane %v1746_v9, 5  ;;  %v1877_v54 = vrot.slane %v1755_v28, 5  ;;  %v2238_v58 = vpop.permute.xlu0 %2237  ;;  %v1771_v22 = vsel %vm4402_vm13, %v3438_v23, %v1770_v50 }
 0x1bf   : > { %2193 = vrot.lane.b32.xlu0 %v3501_v43, %s5422_s22  ;;  %v1779_v13 = vor.u32 %v1777_v11, %v1776_v30  ;;  %v1879_v55 = vrot.slane %v1752_v7, 4  ;;  %v1883_v4 = vshll.u32 %v3445_v44, 16  ;;  %v1887_v63 = vrot.slane %v1765_v8, 4 }
 0x1c0   : > { %v1875_v27 = vor.u32 %v1874_v35, %v1873_v12  ;;  %v2240_v14 = vpop.permute.xlu1 %2239  ;;  %v2320_v28 = vsel %vm2318_vm0, %v2296_v29, %v4885_v15  ;;  %v1888_v23 = vrot.slane %v1768_v32, 5  ;;  %v1891_v8 = vrot.slane %v1777_v11, 5 }
 0x1c1   : > { %v1780_v25 = vsel %vm4402_vm13, %v1772_v24, %v1779_v13  ;;  %v1880_v26 = vor.u32 %v1879_v55, %v1877_v54  ;;  %v1885_v9 = vrot.slane %v1883_v4, 5  ;;  %v2337_v7 = vsel %vm2335_vm1, %v2320_v28, %v4892_v59 }
 0x1c2   : > { %v3502_v51 = vcombine.low %v1771_v22, %v1780_v25  ;;  %v1876_v43 = vrot.slane %v1875_v27, 4  ;;  %v2278_v44 = vpop.permute.xlu0 %2277  ;;  %v1893_v30 = vrot.slane %v1774_v36, 4  ;;  %v1897_v12 = vshll.u32 %v3446_v57, 16  ;;  %v939_v25 = vld [vmem:[%s4351_s10 + $0x54] sm:$0x8] }
 0x1c3   : > { %2249 = vrot.lane.b32.xlu0 %v3509_v48, %s5423_s23  ;;  %v1881_v50 = vrot.slane %v1880_v26, 4  ;;  %v1889_v35 = vor.u32 %v1888_v23, %v1887_v63  ;;  %v2322_v15 = vsel %vm2318_vm0, %v2299_v0, %v4907_v18  ;;  %v3882_v18 = vld [vmem:[%s5379_s3 + $0x20] ss:$0 sps:$4 sm:$0xff]   ;;  %v936_v63 = vld [vmem:[%s4351_s10 + $0x40] sm:$0x8] }
 0x1c4   : > { %2195 = vrot.lane.b32.xlu1 %v3502_v51, %s5422_s22  ;;  %v1878_v24 = vsel %vm4416_vm14, %v1876_v43, %v1877_v54  ;;  %v1894_v29 = vor.u32 %v1893_v30, %v1891_v8  ;;  %v1899_v32 = vrot.slane %v1897_v12, 5  ;;  %v2339_v11 = vsel %vm2335_vm1, %v2322_v15, %v4867_v45  ;;  %v4992_v36 = vpop.permute.xlu1 %1969  ;;  %3747 = vmatprep.subr.msk.bf16.mxu0 %vm2497_vm6, %v3882_v18  ;;  %v945_v23 = vld [vmem:[%s4351_s10 + $0x7c] sm:$0x8] }
 0x1c5   : > { %v1886_v59 = vsel %vm4416_vm14, %v1881_v50, %v1885_v9  ;;  %v1890_v22 = vrot.slane %v1889_v35, 4  ;;  %v2354_v54 = vsel %vm2352_vm2, %v2337_v7, %v4871_v49  ;;  %v2356_v45 = vsel %vm2352_vm2, %v2339_v11, %v4840_v3 }
 0x1c6   : > { %v3517_v48 = vcombine.low %v1878_v24, %v1886_v59  ;;  %v1895_v0 = vrot.slane %v1894_v29, 4  ;;  %v2371_v13 = vsel %vm2369_vm3, %v2354_v54, %v4923_v21  ;;  %v2373_v55 = vsel %vm2369_vm3, %v2356_v45, %v4935_v39  ;;  %v933_v21 = vld [vmem:[%s4351_s10 + $0x2c] sm:$0x8] }
 0x1c7   : > { %v1892_v49 = vsel %vm4416_vm14, %v1890_v22, %v1891_v8  ;;  %v2388_v4 = vsel %vm2386_vm4, %v2371_v13, %v4953_v42  ;;  %v942_v42 = vld [vmem:[%s4351_s10 + $0x68] sm:$0x8]  ;;  %v2499_v9 = vsel %vm2497_vm6, %v3882_v18, 0  ;;  %v999_v28 = vshrl.u32 %v933_v21, 16 }
 0x1c8   : > { %2251 = vrot.lane.b32.xlu1 %v3510_v19, %s5423_s23  ;;  %2289 = vrot.lane.b32.xlu0 %v3517_v48, %s5428_s0  ;;  %v2280_v27 = vpop.permute.xlu0 %2279  ;;  %v1900_v3 = vsel %vm4416_vm14, %v1895_v0, %v1899_v32  ;;  %v2390_v19 = vsel %vm2386_vm4, %v2373_v55, %v4968_v33  ;;  %v2405_v57 = vsel %vm2403_vm5, %v2388_v4, %v2238_v58  ;;  %v1011_v33 = vrot.slane %v4499_v37, 4  ;;  %v1972_v58 = vpop.permute.xlu1 %1971 }
 0x1c9   : > { %v3518_v26 = vcombine.low %v1892_v49, %v1900_v3  ;;  %v2407_v39 = vsel %vm2403_vm5, %v2390_v19, %v2240_v14  ;;  %v2422_v1 = vsel %vm2420_vm7, %v2405_v57, %v2278_v44  ;;  %v1021_v51 = vshrl.u32 %v936_v63, 16  ;;  %3708 = vmatpush3.bf16.msra.mxu0 %v2499_v9 }
 0x1ca   : > { %3709 = vmatprep.mubr.msk.bf16.mxu0 %vm2480_vm8, %v2422_v1  ;;  %v2424_v14 = vsel %vm2420_vm7, %v2407_v39, %v2280_v27  ;;  %v1033_v43 = vrot.slane %v4526_v40, 4  ;;  %v1043_v7 = vshrl.u32 %v939_v25, 16  ;;  %v3357_v44 = vrot.slane %v999_v28, 11 }
 0x1cb   : > { %v1019_v50 = vsel %vm4402_vm13, %v1011_v33, %v4519_v17  ;;  %v1055_v8 = vrot.slane %v4657_v41, 4  ;;  %v1065_v30 = vshrl.u32 %v942_v42, 16  ;;  %v3358_v12 = vrot.slane %v1021_v51, 11  ;;  %v948_v41 = vld [vmem:[%s4351_s10 + $0x90] sm:$0x8] }
 0x1cc   : > { %2291 = vrot.lane.b32.xlu1 %v3518_v26, %s5428_s0  ;;  %v1041_v24 = vsel %vm4402_vm13, %v1033_v43, %v4542_v56  ;;  %v3359_v35 = vrot.slane %v1043_v7, 11  ;;  %v1077_v40 = vrot.slane %v4678_v62, 4  ;;  %v1010_v15 = vsel %vm4402_vm13, %v3357_v44, %v4505_v20  ;;  %3710 = vmatmul.mubr.msk.bf16.vlgmr.msra.gmra.mrb[0].mxu0 %vm2480_vm8, %v2424_v14  ;;  %s4006_s0 = smov 44  }
 0x1cd   : > { %v2010_v37 = vpop.permute.xlu0 %2009  ;;  %v1063_v17 = vsel %vm4402_vm13, %v1055_v8, %v4672_v61  ;;  %v3360_v59 = vrot.slane %v1065_v30, 11  ;;  %v1087_v29 = vshrl.u32 %v945_v23, 16  ;;  %v3449_v32 = vcombine.low %v1010_v15, %v1019_v50 }
 0x1ce   : > { %v1032_v56 = vsel %vm4402_vm13, %v3358_v12, %v4533_v47  ;;  %v1054_v62 = vsel %vm4402_vm13, %v3359_v35, %v4670_v60  ;;  %v1085_v20 = vsel %vm4402_vm13, %v1077_v40, %v4684_v31  ;;  %v1099_v0 = vrot.slane %v4799_v46, 4 }
 0x1cf   : > { %v3450_v11 = vcombine.low %v1032_v56, %v1041_v24  ;;  %v2012_v61 = vpop.permute.xlu1 %2011  ;;  %v3451_v48 = vcombine.low %v1054_v62, %v1063_v17  ;;  %v1076_v22 = vsel %vm4402_vm13, %v3360_v59, %v4682_v6  ;;  %v3361_v54 = vrot.slane %v1087_v29, 11 }
 0x1d0   : > { %v3452_v18 = vcombine.low %v1076_v22, %v1085_v20  ;;  %v1109_v47 = vshrl.u32 %v948_v41, 16  ;;  %v1121_v45 = vrot.slane %v4822_v53, 4  ;;  %v1107_v31 = vsel %vm4402_vm13, %v1099_v0, %v4814_v10 }
 0x1d1   : > { %v1098_v60 = vsel %vm4402_vm13, %v3361_v54, %v4812_v5  ;;  %v2302_v10 = vsel %vm2293_vm15, %v3449_v32, %v4992_v36  ;;  %v2305_v42 = vsel %vm2293_vm15, %v3450_v11, %v1972_v58  ;;  %vm3168_vm14 = vcmask 359424  }
 0x1d2   : > { %v2050_v13 = vpop.permute.xlu0 %2049  ;;  %v3362_v49 = vrot.slane %v1109_v47, 11  ;;  %v5066_v55 = vcombine.low %v1098_v60, %v1107_v31  ;;  %v1129_v6 = vsel %vm4402_vm13, %v1121_v45, %v4828_v16  ;;  %v2324_v57 = vsel %vm2318_vm0, %v2302_v10, %v2010_v37 }
 0x1d3   : > { %v2341_v16 = vsel %vm2335_vm1, %v2324_v57, %v2050_v13  ;;  %v2326_v36 = vsel %vm2318_vm0, %v2305_v42, %v2012_v61  ;;  %v2638_v57 = vld [vmem:[%s5381_s5] sm:$0xf] }
 0x1d4   : > { %v1120_v46 = vsel %vm4402_vm13, %v3362_v49, %v4826_v2  ;;  %3748 = vmatprep.subr.msk.bf16.mxu1 %vm2497_vm6, %v2638_v57  ;;  %vm3165_vm13 = vcmask 293888  }
 0x1d5   : > { %v5074_v5 = vcombine.low %v1120_v46, %v1129_v6 }
 0x1d6   : > { %v2106_v21 = vpop.permute.xlu0 %2105 }
 0x1d7   : > { %v2052_v4 = vpop.permute.xlu1 %2051  ;;  %v2358_v52 = vsel %vm2352_vm2, %v2341_v16, %v2106_v21  ;;  %v2671_v16 = vsel %vm2497_vm6, %v2638_v57, 0 }
 0x1d8   : > { %v2343_v33 = vsel %vm2335_vm1, %v2326_v36, %v2052_v4  ;;  %3726 = vmatpush3.bf16.msra.mxu1 %v2671_v16 }
 0x1da   : > { %v2146_v27 = vpop.permute.xlu0 %2145 }
 0x1db   : > { %v2108_v53 = vpop.permute.xlu1 %2107  ;;  %v2375_v2 = vsel %vm2369_vm3, %v2358_v52, %v2146_v27 }
 0x1dc   : > { %v2360_v14 = vsel %vm2352_vm2, %v2343_v33, %v2108_v53 }
 0x1df   : > { %v2148_v3 = vpop.permute.xlu1 %2147 }
 0x1e0   : > { %v2377_v43 = vsel %vm2369_vm3, %v2360_v14, %v2148_v3 }
 0x1e1   : > { %v2186_v19 = vpop.permute.xlu0 %2185 }
 0x1e2   : > { %v2392_v26 = vsel %vm2386_vm4, %v2375_v2, %v2186_v19 }
 0x1e4   : > { %v2188_v63 = vpop.permute.xlu1 %2187 }
 0x1e5   : > { %v2242_v25 = vpop.permute.xlu0 %2241  ;;  %v2394_v7 = vsel %vm2386_vm4, %v2377_v43, %v2188_v63 }
 0x1e6   : > { %v2409_v1 = vsel %vm2403_vm5, %v2392_v26, %v2242_v25 }
 0x1e8   : > { %v2244_v39 = vpop.permute.xlu1 %2243 }
 0x1e9   : > { %v2282_v9 = vpop.permute.xlu0 %2281  ;;  %v2411_v58 = vsel %vm2403_vm5, %v2394_v7, %v2244_v39 }
 0x1ea   : > { %v2426_v28 = vsel %vm2420_vm7, %v2409_v1, %v2282_v9 }
 0x1eb   : > { %3713 = vmatprep.mubr.msk.bf16.mxu0 %vm2480_vm8, %v2426_v28 }
 0x1ec   : > { %v1974_v51 = vpop.permute.xlu1 %1973 }
 0x1ed   : > { %v2308_v59 = vsel %vm2293_vm15, %v3451_v48, %v1974_v51 }
 0x1ef   : > { %v2284_v23 = vpop.permute.xlu0 %2283 }
 0x1f0   : > { %v2428_v44 = vsel %vm2420_vm7, %v2411_v58, %v2284_v23  ;;  %v1976_v50 = vpop.permute.xlu1 %1975 }
 0x1f1   : > { %3714 = vmatmul.mubr.msk.bf16.gmra.mrb[4].mxu0 %vm2480_vm8, %v2428_v44  ;;  %v2311_v22 = vsel %vm2293_vm15, %v3452_v18, %v1976_v50 }
 0x1f4   : > { %v2014_v37 = vpop.permute.xlu0 %2013 }
 0x1f5   : > { %v2328_v29 = vsel %vm2318_vm0, %v2308_v59, %v2014_v37 }
 0x1f6   : > { %v2016_v8 = vpop.permute.xlu1 %2015 }
 0x1f7   : > { %v2330_v48 = vsel %vm2318_vm0, %v2311_v22, %v2016_v8 }
 0x1f9   : > { %v2054_v30 = vpop.permute.xlu0 %2053 }
 0x1fa   : > { %v2345_v32 = vsel %vm2335_vm1, %v2328_v29, %v2054_v30  ;;  %v5141_v30 = vld [vmem:[%s5380_s4] ss:$0 sm:$0xff] }
 0x1fd   : > { %v2110_v24 = vpop.permute.xlu0 %2109 }
 0x1fe   : > { %v2056_v12 = vpop.permute.xlu1 %2055  ;;  %v2362_v62 = vsel %vm2352_vm2, %v2345_v32, %v2110_v24 }
 0x1ff   : > { %v2347_v13 = vsel %vm2335_vm1, %v2330_v48, %v2056_v12 }
 0x201   : > { %v2150_v40 = vpop.permute.xlu0 %2149 }
 0x202   : > { %v2112_v35 = vpop.permute.xlu1 %2111  ;;  %v2379_v20 = vsel %vm2369_vm3, %v2362_v62, %v2150_v40  ;;  %v3886_v62 = vld [vmem:[%s4351_s10 + $0x20] sm:$0xf] }
 0x203   : > { %v2364_v60 = vsel %vm2352_vm2, %v2347_v13, %v2112_v35  ;;  %v3883_v35 = vld [vmem:[%s4351_s10 + $0x30] sm:$0xf] }
 0x204   : > { %v2600_v40 = vunpack.c.l.bf16 %v3883_v35 }
 0x206   : > { %v2152_v15 = vpop.permute.xlu1 %2151 }
 0x207   : > { %v2381_v31 = vsel %vm2369_vm3, %v2364_v60, %v2152_v15 }
 0x208   : > { %v2190_v17 = vpop.permute.xlu0 %2189 }
 0x209   : > { %v2396_v11 = vsel %vm2386_vm4, %v2379_v20, %v2190_v17  ;;  %v3884_v17 = vld [vmem:[%s4351_s10 + $0x34] sm:$0xf]  ;;  %v2599_v20 = vunpack.c.l.bf16 %v3886_v62  ;;  %v5430_v62 = vld [vmem:[#allocation6_spill] sm:$0xff] }
 0x20a   : > { %v2601_v59 = vunpack.c.l.bf16 %v3884_v17 }
 0x20b   : > { %v2192_v41 = vpop.permute.xlu1 %2191 }
 0x20c   : > { %v2246_v56 = vpop.permute.xlu0 %2245  ;;  %v2398_v49 = vsel %vm2386_vm4, %v2381_v31, %v2192_v41  ;;  %v3885_v41 = vld [vmem:[%s4351_s10 + $0x1c] sm:$0xf] }
 0x20d   : > { %v2413_v54 = vsel %vm2403_vm5, %v2396_v11, %v2246_v56  ;;  %v2598_v32 = vunpack.c.l.bf16 %v3885_v41 }
 0x20f   : > { %v2248_v61 = vpop.permute.xlu1 %2247 }
 0x210   : > { %v2286_v0 = vpop.permute.xlu0 %2285  ;;  %v2415_v18 = vsel %vm2403_vm5, %v2398_v49, %v2248_v61  ;;  %v3887_v49 = vld [vmem:[%s4351_s10 + $0x58] sm:$0xf] }
 0x211   : > { %v2430_v47 = vsel %vm2420_vm7, %v2413_v54, %v2286_v0 }
 0x212   : > { %3717 = vmatprep.mubr.msk.bf16.mxu0 %vm2480_vm8, %v2430_v47 }
 0x213   : > { %v1978_v45 = vpop.permute.xlu1 %1977 }
 0x214   : > { %v2314_v2 = vsel %vm2293_vm15, %v5066_v55, %v1978_v45 }
 0x216   : > { %v2288_v6 = vpop.permute.xlu0 %2287 }
 0x217   : > { %v2432_v46 = vsel %vm2420_vm7, %v2415_v18, %v2288_v6  ;;  %v1980_v4 = vpop.permute.xlu1 %1979  ;;  %v2604_v18 = vunpack.c.l.bf16 %v3887_v49 }
 0x218   : > { %3718 = vmatmul.mubr.msk.bf16.gmra.mrb[8].mxu0 %vm2480_vm8, %v2432_v46  ;;  %v2317_v36 = vsel %vm2293_vm15, %v5074_v5, %v1980_v4  ;;  %v3888_v46 = vld [vmem:[%s4351_s10 + $0x5c] sm:$0xf] }
 0x219   : > { %v2605_v4 = vunpack.c.l.bf16 %v3888_v46  ;;  %v3999_v46 = vmov 1983009808  }
 0x21b   : > { %v2018_v21 = vpop.permute.xlu0 %2017 }
 0x21c   : > { %v2332_v26 = vsel %vm2318_vm0, %v2314_v2, %v2018_v21 }
 0x21d   : > { %v2020_v53 = vpop.permute.xlu1 %2019 }
 0x21e   : > { %v2334_v33 = vsel %vm2318_vm0, %v2317_v36, %v2020_v53  ;;  %v3889_v53 = vld [vmem:[%s4351_s10 + $0x44] sm:$0xf]  ;;  %v3891_v36 = vld [vmem:[%s4351_s10 + $0x80] sm:$0xf] }
 0x220   : > { %v2058_v27 = vpop.permute.xlu0 %2057 }
 0x221   : > { %v2349_v42 = vsel %vm2335_vm1, %v2332_v26, %v2058_v27  ;;  %v2602_v27 = vunpack.c.l.bf16 %v3889_v53  ;;  %v5191_v53 = vld [vmem:[%s5382_s6] ss:$0 sm:$0xff] }
 0x224   : > { %v2114_v19 = vpop.permute.xlu0 %2113 }
 0x225   : > { %v2060_v3 = vpop.permute.xlu1 %2059  ;;  %v2366_v9 = vsel %vm2352_vm2, %v2349_v42, %v2114_v19  ;;  %v3890_v19 = vld [vmem:[%s4351_s10 + $0x48] sm:$0xf] }
 0x226   : > { %v2351_v51 = vsel %vm2335_vm1, %v2334_v33, %v2060_v3 }
 0x228   : > { %v2154_v63 = vpop.permute.xlu0 %2153 }
 0x229   : > { %v2116_v10 = vpop.permute.xlu1 %2115  ;;  %v2383_v28 = vsel %vm2369_vm3, %v2366_v9, %v2154_v63 }
 0x22a   : > { %v2368_v58 = vsel %vm2352_vm2, %v2351_v51, %v2116_v10  ;;  %v2603_v10 = vunpack.c.l.bf16 %v3890_v19 }
 0x22d   : > { %v2156_v25 = vpop.permute.xlu1 %2155 }
 0x22e   : > { %v2385_v5 = vsel %vm2369_vm3, %v2368_v58, %v2156_v25 }
 0x231   : > { %v2194_v52 = vpop.permute.xlu0 %2193 }
 0x232   : > { %v2400_v14 = vsel %vm2386_vm4, %v2383_v28, %v2194_v52  ;;  %v2608_v28 = vunpack.c.l.bf16 %v3891_v36 }
 0x235   : > { %v2250_v39 = vpop.permute.xlu0 %2249 }
 0x236   : > { %v2196_v1 = vpop.permute.xlu1 %2195  ;;  %v2417_v55 = vsel %vm2403_vm5, %v2400_v14, %v2250_v39  ;;  %v3892_v14 = vld [vmem:[%s4351_s10 + $0x84] sm:$0xf] }
 0x237   : > { %v2402_v44 = vsel %vm2386_vm4, %v2385_v5, %v2196_v1  ;;  %v2609_v51 = vunpack.c.l.bf16 %v3892_v14 }
 0x23a   : > { %v2252_v43 = vpop.permute.xlu1 %2251  ;;  %v2290_v7 = vpop.permute.xlu0 %2289 }
 0x23b   : > { %v2434_v23 = vsel %vm2420_vm7, %v2417_v55, %v2290_v7  ;;  %v2419_v50 = vsel %vm2403_vm5, %v2402_v44, %v2252_v43  ;;  %v3893_v43 = vld [vmem:[%s4351_s10 + $0x6c] sm:$0xf] }
 0x23c   : > { %3721 = vmatprep.mubr.msk.bf16.mxu0 %vm2480_vm8, %v2434_v23  ;;  %v2606_v7 = vunpack.c.l.bf16 %v3893_v43  ;;  %v3894_v23 = vld [vmem:[%s4351_s10 + $0x70] sm:$0xf]  ;;  %s3586_s10 = sshll.u32 %s3973_s27, 6 }
 0x23d   : > { %v2607_v5 = vunpack.c.l.bf16 %v3894_v23  ;;  %s5185_s1 = scalar_lea.vmem %s4131_s13, %s3586_s10  ;;  %s4001_s13 = smov 4  }
 0x23e   : > { %v2292_v37 = vpop.permute.xlu1 %2291  ;;  %v3620_v19 = vld [vmem:[%s5185_s1 + $0x10] sm:$0xff]   ;;  %s4003_s10 = smov 20  }
 0x23f   : > { %v2436_v8 = vsel %vm2420_vm7, %v2419_v50, %v2292_v37  ;;  %v3598_v43 = vunpack.c.h.bf16 %v3620_v19 }
 0x240   : > { %3722 = vmatmul.mubr.msk.bf16.gmra.mrb[12].mxu0 %vm2480_vm8, %v2436_v8 }
 0x29f   : > { %v3711_v12 = vpop.f32.mrb[0].mxu0 }
 0x2a0   : > { %v2544_v24 = vadd.f32 %v3711_v12, %v5141_v30  ;;  %v2535_v15 = vpop.f32.mrb[1].mxu0 }
 0x2a1   : > { %v2536_v29 = vadd.f32 %v5141_v30, %v2535_v15  ;;  %v3712_v56 = vpop.f32.mrb[2].mxu0 }
 0x2a2   : > { %v2547_v11 = vadd.f32 %v3712_v56, %v5141_v30  ;;  %v2538_v61 = vpop.f32.mrb[3].mxu0  ;;  %v2616_v54 = vadd.f32 %v2600_v40, %v2544_v24 }
 0x2a3   : > { %v2539_v22 = vadd.f32 %v5141_v30, %v2538_v61  ;;  %v2614_v48 = vadd.f32 %v2598_v32, %v2536_v29  ;;  %v2612_v29 = vunpack.c.l.bf16 %v4853_v34  ;;  %v2613_v32 = vunpack.c.l.bf16 %v4864_v38  ;;  %v5431_v61 = vld [vmem:[#allocation7_spill] sm:$0xff] }
 0x2a4   : > { %v2617_v0 = vadd.f32 %v2601_v59, %v2547_v11 }
 0x2a5   : > { %v2615_v47 = vadd.f32 %v2599_v20, %v2539_v22  ;;  %v2610_v20 = vunpack.c.l.bf16 %v5430_v62  ;;  %v2611_v22 = vunpack.c.l.bf16 %v5431_v61 }
 0x2a6   : > { %v2631_v13 = vpack.c.bf16 %v2617_v0, %v2616_v54 }
 0x2a7   : > { %v2630_v60 = vpack.c.bf16 %v2615_v47, %v2614_v48 }
 0x2a9   : > { %3727 = vmatprep.mubr.msk.bf16.mxu1 %vm2293_vm15, %v2630_v60 }
 0x2aa   : > { %3728 = vmatmul.mubr.msk.bf16.vlgmr.msra.gmra.mrb[0].mxu1 %vm2293_vm15, %v2631_v13 }
 0x2c4   : > { %v3715_v45 = vpop.f32.mrb[4].mxu0 }
 0x2c5   : > { %v2560_v31 = vadd.f32 %v3715_v45, %v5141_v30  ;;  %v2551_v6 = vpop.f32.mrb[5].mxu0 }
 0x2c6   : > { %v2552_v21 = vadd.f32 %v5141_v30, %v2551_v6  ;;  %v3716_v3 = vpop.f32.mrb[6].mxu0 }
 0x2c7   : > { %v2563_v57 = vadd.f32 %v3716_v3, %v5141_v30  ;;  %v2554_v63 = vpop.f32.mrb[7].mxu0  ;;  %v2620_v25 = vadd.f32 %v2604_v18, %v2560_v31  ;;  %v3588_v3 = vld [vmem:[%s5185_s1] sm:$0xff]  }
 0x2c8   : > { %v2555_v16 = vadd.f32 %v5141_v30, %v2554_v63  ;;  %v2618_v2 = vadd.f32 %v2602_v27, %v2552_v21  ;;  %v2826_v21 = vlaneseq  ;;  %v3621_v27 = vld [vmem:[%s5185_s1 + $0x18] sm:$0xff]   ;;  %v3590_v14 = vunpack.c.h.bf16 %v3588_v3 }
 0x2c9   : > { %v2621_v52 = vadd.f32 %v2605_v4, %v2563_v57  ;;  %v2824_v4 = vunpack.c.l.s4 %v3999_v46  ;;  %v3601_v63 = vunpack.c.l.bf16 %v3621_v27 }
 0x2ca   : > { %v2619_v26 = vadd.f32 %v2603_v10, %v2555_v16 }
 0x2cb   : > { %v2633_v39 = vpack.c.bf16 %v2621_v52, %v2620_v25  ;;  %v2825_v16 = vunpack.c.0.s8 %v2824_v4  ;;  %v2827_v25 = vshrl.u32 %v2826_v21, 7  ;;  %v4000_v21 = vmov 1934713408  }
 0x2cc   : > { %v2632_v42 = vpack.c.bf16 %v2619_v26, %v2618_v2  ;;  %v3589_v2 = vunpack.c.l.bf16 %v3588_v3 }
 0x2cd   : > { %v5202_v23 = vsub.s32 %v2825_v16, %v2827_v25 }
 0x2ce   : > { %3731 = vmatprep.mubr.msk.bf16.mxu1 %vm2293_vm15, %v2632_v42 }
 0x2cf   : > { %3732 = vmatmul.mubr.msk.bf16.gmra.mrb[4].mxu1 %vm2293_vm15, %v2633_v39  ;;  %v3597_v39 = vunpack.c.l.bf16 %v3620_v19  ;;  %v3623_v19 = vld [vmem:[%s5185_s1 + $0x28] sm:$0xff]  }
 0x2eb   : > { %v3719_v1 = vpop.f32.mrb[8].mxu0 }
 0x2ec   : > { %v2576_v9 = vadd.f32 %v3719_v1, %v5141_v30  ;;  %v2567_v33 = vpop.f32.mrb[9].mxu0 }
 0x2ed   : > { %v2568_v55 = vadd.f32 %v5141_v30, %v2567_v33  ;;  %v3720_v58 = vpop.f32.mrb[10].mxu0 }
 0x2ee   : > { %v2579_v44 = vadd.f32 %v3720_v58, %v5141_v30  ;;  %v2570_v50 = vpop.f32.mrb[11].mxu0  ;;  %v2624_v8 = vadd.f32 %v2608_v28, %v2576_v9  ;;  %v3602_v28 = vunpack.c.h.bf16 %v3621_v27  ;;  %v2888_v27 = vunpack.c.l.s4 %v4000_v21 }
 0x2ef   : > { %v2571_v37 = vadd.f32 %v5141_v30, %v2570_v50  ;;  %v2622_v24 = vadd.f32 %v2606_v7, %v2568_v55 }
 0x2f0   : > { %v2625_v12 = vadd.f32 %v2609_v51, %v2579_v44  ;;  %v2889_v3 = vunpack.c.0.s8 %v2888_v27 }
 0x2f1   : > { %v2623_v35 = vadd.f32 %v2607_v5, %v2571_v37 }
 0x2f2   : > { %v2635_v40 = vpack.c.bf16 %v2625_v12, %v2624_v8  ;;  %v5242_v16 = vsub.s32 %v2889_v3, %v2827_v25 }
 0x2f3   : > { %v2634_v15 = vpack.c.bf16 %v2623_v35, %v2622_v24 }
 0x2f5   : > { %3735 = vmatprep.mubr.msk.bf16.mxu1 %vm2293_vm15, %v2634_v15 }
 0x2f6   : > { %3736 = vmatmul.mubr.msk.bf16.gmra.mrb[8].mxu1 %vm2293_vm15, %v2635_v40 }
 0x313   : > { %v3723_v17 = vpop.f32.mrb[12].mxu0 }
 0x314   : > { %v2592_v59 = vadd.f32 %v3723_v17, %v5141_v30  ;;  %v2583_v41 = vpop.f32.mrb[13].mxu0 }
 0x315   : > { %v2584_v56 = vadd.f32 %v5141_v30, %v2583_v41  ;;  %v3724_v11 = vpop.f32.mrb[14].mxu0 }
 0x316   : > { %v2595_v54 = vadd.f32 %v3724_v11, %v5141_v30  ;;  %v2586_v0 = vpop.f32.mrb[15].mxu0  ;;  %v2628_v47 = vadd.f32 %v2612_v29, %v2592_v59 }
 0x317   : > { %v2587_v48 = vadd.f32 %v5141_v30, %v2586_v0  ;;  %v2626_v34 = vadd.f32 %v2610_v20, %v2584_v56  ;;  %v3619_v30 = vld [vmem:[%s5185_s1 + $0x8] sm:$0xff]  }
 0x318   : > { %v2629_v13 = vadd.f32 %v2613_v32, %v2595_v54  ;;  %v3593_v10 = vunpack.c.l.bf16 %v3619_v30  ;;  %v3594_v1 = vunpack.c.h.bf16 %v3619_v30 }
 0x319   : > { %v2627_v60 = vadd.f32 %v2611_v22, %v2587_v48 }
 0x31a   : > { %v2637_v45 = vpack.c.bf16 %v2629_v13, %v2628_v47 }
 0x31b   : > { %v2636_v38 = vpack.c.bf16 %v2627_v60, %v2626_v34 }
 0x31d   : > { %3739 = vmatprep.mubr.msk.bf16.mxu1 %vm2293_vm15, %v2636_v38 }
 0x31e   : > { %3740 = vmatmul.mubr.msk.bf16.gmra.mrb[12].mxu1 %vm2293_vm15, %v2637_v45 }
 0x37d   : > { %v3729_v31 = vpop.f32.mrb[0].mxu1 }
 0x37e   : > { %v2707_v49 = vpop.f32.mrb[1].mxu1  ;;  %v2716_v57 = vadd.f32 %v3729_v31, %v5191_v53 }
 0x37f   : > { %v3730_v18 = vpop.f32.mrb[2].mxu1  ;;  %v2708_v52 = vadd.f32 %v5191_v53, %v2707_v49 }
 0x380   : > { %v2710_v6 = vpop.f32.mrb[3].mxu1  ;;  %v2719_v42 = vadd.f32 %v3730_v18, %v5191_v53  ;;  %v2807_v7 = vadd.f32 %v3593_v10, %v2716_v57  ;;  %v3625_v10 = vld [vmem:[%s5185_s1 + $0x38] sm:$0xff]   ;;  %v3622_v57 = vld [vmem:[%s5185_s1 + $0x20] sm:$0xff]  }
 0x381   : > { %v2711_v33 = vadd.f32 %v5191_v53, %v2710_v6  ;;  %v2805_v50 = vadd.f32 %v3589_v2, %v2708_v52  ;;  %v3609_v2 = vunpack.c.l.bf16 %v3623_v19 }
 0x382   : > { %v2808_v12 = vadd.f32 %v3594_v1, %v2719_v42  ;;  %v3605_v42 = vunpack.c.l.bf16 %v3622_v57  ;;  %v3610_v1 = vunpack.c.h.bf16 %v3623_v19 }
 0x383   : > { %v2806_v15 = vadd.f32 %v3590_v14, %v2711_v33  ;;  %v3606_v33 = vunpack.c.h.bf16 %v3622_v57 }
 0x3a2   : > { %v3733_v26 = vpop.f32.mrb[4].mxu1 }
 0x3a3   : > { %v2732_v9 = vadd.f32 %v3733_v26, %v5191_v53  ;;  %v2723_v36 = vpop.f32.mrb[5].mxu1  ;;  %v3617_v26 = vunpack.c.l.bf16 %v3625_v10 }
 0x3a4   : > { %v2724_v51 = vadd.f32 %v5191_v53, %v2723_v36  ;;  %v3734_v55 = vpop.f32.mrb[6].mxu1 }
 0x3a5   : > { %v2811_v58 = vadd.f32 %v3601_v63, %v2732_v9  ;;  %v2735_v5 = vadd.f32 %v3734_v55, %v5191_v53  ;;  %v2726_v44 = vpop.f32.mrb[7].mxu1  ;;  %v3624_v63 = vld [vmem:[%s5185_s1 + $0x30] sm:$0xff]   ;;  %v3618_v55 = vunpack.c.h.bf16 %v3625_v10  ;;  %s4004_s1 = smov 28  }
 0x3a6   : > { %v2809_v37 = vadd.f32 %v3597_v39, %v2724_v51  ;;  %v2727_v8 = vadd.f32 %v5191_v53, %v2726_v44  ;;  %v3613_v36 = vunpack.c.l.bf16 %v3624_v63 }
 0x3a7   : > { %v2837_v24 = vcombine.low %v2807_v7, %v2811_v58  ;;  %v2838_v35 = vcombine.high %v2807_v7, %v2811_v58  ;;  %v2812_v40 = vadd.f32 %v3602_v28, %v2735_v5  ;;  %v3614_v58 = vunpack.c.h.bf16 %v3624_v63 }
 0x3a8   : > { %v2821_v17 = vcombine.low %v2805_v50, %v2809_v37  ;;  %v2822_v59 = vcombine.high %v2805_v50, %v2809_v37  ;;  %v2810_v29 = vadd.f32 %v3598_v43, %v2727_v8 }
 0x3a9   : > { %v2845_v41 = vrot.slane %v2837_v24, %v5202_v23  ;;  %v5208_v32 = vrot.slane %v2838_v35, %v5202_v23  ;;  %v2973_v56 = vcombine.low %v2808_v12, %v2812_v40  ;;  %v2974_v62 = vcombine.high %v2808_v12, %v2812_v40 }
 0x3aa   : > { %v2829_v20 = vrot.slane %v2821_v17, %v5202_v23  ;;  %v5212_v11 = vrot.slane %v2822_v59, %v5202_v23  ;;  %v2957_v61 = vcombine.low %v2806_v15, %v2810_v29  ;;  %v2958_v22 = vcombine.high %v2806_v15, %v2810_v29 }
 0x3ab   : > { %v5215_v54 = vrot.slane %v2973_v56, %v5202_v23  ;;  %v5218_v0 = vrot.slane %v2974_v62, %v5202_v23 }
 0x3ac   : > { %v5221_v48 = vrot.slane %v2957_v61, %v5202_v23  ;;  %v5224_v47 = vrot.slane %v2958_v22, %v5202_v23  ;;  %v2886_v13 = vcombine.high %v2829_v20, %v2845_v41  ;;  %v2885_v34 = vcombine.low %v2829_v20, %v2845_v41 }
 0x3ad   : > { %v2901_v60 = vcombine.low %v5212_v11, %v5208_v32  ;;  %v2902_v45 = vcombine.high %v5212_v11, %v5208_v32 }
 0x3ae   : > { %v3021_v38 = vcombine.low %v5221_v48, %v5215_v54  ;;  %v3022_v31 = vcombine.high %v5221_v48, %v5215_v54  ;;  %v3037_v49 = vcombine.low %v5224_v47, %v5218_v0  ;;  %v3038_v18 = vcombine.high %v5224_v47, %v5218_v0 }
 0x3af   : > { %v5251_v5 = vrot.slane %v2886_v13, %v5242_v16  ;;  %v5255_v12 = vrot.slane %v2885_v34, %v5242_v16  ;;  %v5259_v15 = vrot.slane %v2901_v60, %v5242_v16 }
 0x3b0   : > { %v3029_v21 = vrot.slane %v3021_v38, %v5242_v16 }
 0x3c9   : > { %v3737_v6 = vpop.f32.mrb[8].mxu1 }
 0x3ca   : > { %v2739_v30 = vpop.f32.mrb[9].mxu1  ;;  %v2748_v52 = vadd.f32 %v3737_v6, %v5191_v53 }
 0x3cb   : > { %v3738_v46 = vpop.f32.mrb[10].mxu1  ;;  %v2740_v39 = vadd.f32 %v5191_v53, %v2739_v30 }
 0x3cc   : > { %v2742_v4 = vpop.f32.mrb[11].mxu1  ;;  %v2751_v28 = vadd.f32 %v3738_v46, %v5191_v53  ;;  %v2815_v44 = vadd.f32 %v3609_v2, %v2748_v52  ;;  %v3036_v52 = vrot.slane %v3022_v31, %v5242_v16 }
 0x3cd   : > { %v2743_v25 = vadd.f32 %v5191_v53, %v2742_v4  ;;  %v2813_v24 = vadd.f32 %v3605_v42, %v2740_v39  ;;  %v2916_v4 = vrot.slane %v2902_v45, %v5242_v16  ;;  %v3045_v45 = vrot.slane %v3037_v49, %v5242_v16 }
 0x3ce   : > { %v2816_v17 = vadd.f32 %v3610_v1, %v2751_v28 }
 0x3cf   : > { %v2814_v32 = vadd.f32 %v3606_v33, %v2743_v25 }
 0x3f1   : > { %v3741_v9 = vpop.f32.mrb[12].mxu1 }
 0x3f2   : > { %v2764_v14 = vadd.f32 %v3741_v9, %v5191_v53  ;;  %v2755_v51 = vpop.f32.mrb[13].mxu1 }
 0x3f3   : > { %v2756_v43 = vadd.f32 %v5191_v53, %v2755_v51  ;;  %v3742_v7 = vpop.f32.mrb[14].mxu1 }
 0x3f4   : > { %v2819_v50 = vadd.f32 %v3617_v26, %v2764_v14  ;;  %v2767_v37 = vadd.f32 %v3742_v7, %v5191_v53  ;;  %v2758_v8 = vpop.f32.mrb[15].mxu1  ;;  %v3052_v7 = vrot.slane %v3038_v18, %v5242_v16 }
 0x3f5   : > { %v2817_v35 = vadd.f32 %v3613_v36, %v2756_v43  ;;  %v2759_v40 = vadd.f32 %v5191_v53, %v2758_v8 }
 0x3f6   : > { %v2869_v59 = vcombine.low %v2815_v44, %v2819_v50  ;;  %v2870_v29 = vcombine.high %v2815_v44, %v2819_v50  ;;  %v2820_v41 = vadd.f32 %v3618_v55, %v2767_v37 }
 0x3f7   : > { %v2853_v56 = vcombine.low %v2813_v24, %v2817_v35  ;;  %v2854_v62 = vcombine.high %v2813_v24, %v2817_v35  ;;  %v2818_v20 = vadd.f32 %v3614_v58, %v2759_v40 }
 0x3f8   : > { %v2877_v11 = vrot.slane %v2869_v59, %v5202_v23  ;;  %v2884_v61 = vrot.slane %v2870_v29, %v5202_v23  ;;  %v3005_v22 = vcombine.low %v2816_v17, %v2820_v41  ;;  %v3006_v13 = vcombine.high %v2816_v17, %v2820_v41 }
 0x3f9   : > { %v2861_v34 = vrot.slane %v2853_v56, %v5202_v23  ;;  %v2868_v53 = vrot.slane %v2854_v62, %v5202_v23  ;;  %v2989_v60 = vcombine.low %v2814_v32, %v2818_v20  ;;  %v2990_v6 = vcombine.high %v2814_v32, %v2818_v20 }
 0x3fa   : > { %v3013_v30 = vrot.slane %v3005_v22, %v5202_v23  ;;  %v3020_v46 = vrot.slane %v3006_v13, %v5202_v23 }
 0x3fb   : > { %v2997_v27 = vrot.slane %v2989_v60, %v5202_v23  ;;  %v3004_v3 = vrot.slane %v2990_v6, %v5202_v23  ;;  %v2918_v19 = vcombine.high %v2861_v34, %v2877_v11  ;;  %v2917_v10 = vcombine.low %v2861_v34, %v2877_v11 }
 0x3fc   : > { %v2933_v57 = vcombine.low %v2868_v53, %v2884_v61  ;;  %v2934_v63 = vcombine.high %v2868_v53, %v2884_v61 }
 0x3fd   : > { %v2932_v38 = vrot.slane %v2918_v19, %v5242_v16  ;;  %v2925_v2 = vrot.slane %v2917_v10, %v5242_v16  ;;  %v3053_v26 = vcombine.low %v2997_v27, %v3013_v30  ;;  %v3054_v23 = vcombine.high %v2997_v27, %v3013_v30 }
 0x3fe   : > { %v2941_v39 = vrot.slane %v2933_v57, %v5242_v16  ;;  %v2948_v42 = vrot.slane %v2934_v63, %v5242_v16  ;;  %v3069_v1 = vcombine.low %v3004_v3, %v3020_v46  ;;  %v3070_v9 = vcombine.high %v3004_v3, %v3020_v46 }
 0x3ff   : > { %v2951_v54 = vcombine.low %v5251_v5, %v2932_v38  ;;  %v2950_v48 = vcombine.high %v5255_v12, %v2925_v2  ;;  %v2952_v31 = vcombine.high %v5251_v5, %v2932_v38  ;;  %v3061_v49 = vrot.slane %v3053_v26, %v5242_v16 }
 0x400   : > { %v2953_v36 = vcombine.low %v5259_v15, %v2941_v39  ;;  %v2955_v28 = vcombine.low %v2916_v4, %v2948_v42  ;;  %v2954_v33 = vcombine.high %v5259_v15, %v2941_v39  ;;  %v2956_v14 = vcombine.high %v2916_v4, %v2948_v42 }
 0x401   : > { %3098 = vrot.lane.b32.xlu1 %v2951_v54, %s5425_s18  ;;  %3094 = vrot.lane.b32.xlu0 %v2950_v48, %s4001_s13  ;;  %v3085_v51 = vcombine.low %v3029_v21, %v3061_v49  ;;  %v3068_v55 = vrot.slane %v3054_v23, %v5242_v16  ;;  %v3086_v25 = vcombine.high %v3029_v21, %v3061_v49  ;;  %s4002_s18 = smov 12   ;;  %s4008_s13 = smov 60  }
 0x402   : > { %v3077_v43 = vrot.slane %v3069_v1, %v5242_v16  ;;  %v3084_v58 = vrot.slane %v3070_v9, %v5242_v16  ;;  %v2949_v5 = vcombine.low %v5255_v12, %v2925_v2 }
 0x403   : > { %v3087_v44 = vcombine.low %v3036_v52, %v3068_v55  ;;  %v3088_v50 = vcombine.high %v3036_v52, %v3068_v55 }
 0x404   : > { %v3089_v37 = vcombine.low %v3045_v45, %v3077_v43  ;;  %v3091_v8 = vcombine.low %v3052_v7, %v3084_v58  ;;  %v3090_v24 = vcombine.high %v3045_v45, %v3077_v43  ;;  %v3092_v35 = vcombine.high %v3052_v7, %v3084_v58 }
 0x405   : > { %3106 = vrot.lane.b32.xlu1 %v2953_v36, %s5424_s17  ;;  %3102 = vrot.lane.b32.xlu0 %v2952_v31, %s4002_s18  ;;  %s4007_s17 = smov 52  }
 0x409   : > { %3114 = vrot.lane.b32.xlu1 %v2955_v28, %s5419_s20  ;;  %3110 = vrot.lane.b32.xlu0 %v2954_v33, %s4003_s10 }
 0x40d   : > { %3122 = vrot.lane.b32.xlu1 %v3085_v51, %s5420_s9  ;;  %3118 = vrot.lane.b32.xlu0 %v2956_v14, %s4004_s1  ;;  %s5434_s1 = sand.u32 1, %s3965_s25  }
 0x411   : > { %3130 = vrot.lane.b32.xlu1 %v3087_v44, %s5421_s16  ;;  %3126 = vrot.lane.b32.xlu0 %v3086_v25, %s4005_s2  ;;  %s5432_s16 = scalar_lea.vmem [#allocation3], %s4125_s21  ;;  %s3178_s2 = scalar_lea.sflag [#allocation4], %s5434_s1 }
 0x415   : > { %3138 = vrot.lane.b32.xlu1 %v3089_v37, %s5422_s22  ;;  %3134 = vrot.lane.b32.xlu0 %v3088_v50, %s4006_s0  ;;  %s3193_s22 = sshll.u32 %s5432_s16, 4  ;;  %s5320_s22 = int_to_ptr.vmem [resolvable:$true] %s3193_s22 }
 0x416   : > { %s3895_s0 = scalar_lea.vmem %s5320_s22, 128 }
 0x417   : > { %p3896_p0 = scmp.ne.s32.totalorder %s5320_s22, %s3895_s0 }
 0x419   : > { %3146 = vrot.lane.b32.xlu1 %v3091_v8, %s5423_s23  ;;  %3142 = vrot.lane.b32.xlu0 %v3090_v24, %s4007_s17  ;;  %s3545_s23 = sshll.u32 %s3977_s28, 1  ;;  %p3897_p1 = pnand %p3896_p0, %p4101_p3 }
 0x41a   : > { %s3189_s20 = sadd.s32 %s3973_s27, %s3545_s23  ;;  %s5433_s27 = smov %s5432_s16 }
 0x41b   : > { %s3546_s9 = sshll.u32 %s3189_s20, 7  ;;  %p3898_p2 = pneg %p3897_p1 }
 0x41c   : > { %s5318_s10 = scalar_lea.hbm %s5383_s7, %s3546_s9  ;;  %s4009_s17 = smov [#allocation3]  }
 0x41d   : > { %3150 = vrot.lane.b32.xlu0 %v3092_v35, %s4008_s13  ;;  %s3899_s13 = sshll.u32 %s4009_s17, 4  ;;  %s3900_s13 = int_to_ptr.vmem [resolvable:$false] %s3899_s13 }
 0x41e   : > { %s3901_s23 = scalar_lea.vmem %s3900_s13, 256  ;;  %p3902_p4 = scmp.lt.s32.totalorder %s5320_s22, %s3900_s13 }
 0x41f   : > { %p3903_p5 = scmp.lt.s32.totalorder %s3901_s23, %s3895_s0 }
 0x421   : > { %p3904_p6 = por %p3903_p5, %p3902_p4 }
 0x423   : > { %p3905_p7 = pnand %p3904_p6, %p3898_p2 }
 0x473   : > { %v3099_v0 = vpop.permute.xlu1 %3098  ;;  %v3095_v47 = vpop.permute.xlu0 %3094 }
 0x474   : > { %v3154_v18 = vsel %vm3153_vm9, %v2949_v5, %v3095_v47 }
 0x475   : > { %v3155_v40 = vsel %vm2293_vm15, %v3154_v18, %v3099_v0  ;;  %vm3171_vm15 = vcmask 424960  }
 0x477   : > { %v3107_v16 = vpop.permute.xlu1 %3106  ;;  %v3103_v12 = vpop.permute.xlu0 %3102 }
 0x478   : > { %v3157_v15 = vsel %vm3156_vm10, %v3155_v40, %v3103_v12 }
 0x479   : > { %v3158_v29 = vsel %vm2318_vm0, %v3157_v15, %v3107_v16  ;;  %vm3174_vm0 = vcmask 490496  }
 0x47b   : > { %v3115_v17 = vpop.permute.xlu1 %3114  ;;  %v3111_v59 = vpop.permute.xlu0 %3110 }
 0x47c   : > { %v3160_v41 = vsel %vm3159_vm11, %v3158_v29, %v3111_v59 }
 0x47d   : > { %v3161_v62 = vsel %vm2335_vm1, %v3160_v41, %v3115_v17 }
 0x47f   : > { %v3123_v32 = vpop.permute.xlu1 %3122  ;;  %v3119_v56 = vpop.permute.xlu0 %3118 }
 0x480   : > { %v3163_v20 = vsel %vm3162_vm12, %v3161_v62, %v3119_v56 }
 0x481   : > { %v3164_v22 = vsel %vm2352_vm2, %v3163_v20, %v3123_v32 }
 0x483   : > { %v3131_v11 = vpop.permute.xlu1 %3130  ;;  %v3127_v61 = vpop.permute.xlu0 %3126 }
 0x484   : > { %v3166_v13 = vsel %vm3165_vm13, %v3164_v22, %v3127_v61 }
 0x485   : > { %v3167_v60 = vsel %vm2369_vm3, %v3166_v13, %v3131_v11 }
 0x487   : > { %v3139_v34 = vpop.permute.xlu1 %3138  ;;  %v3135_v53 = vpop.permute.xlu0 %3134 }
 0x488   : > { %v3169_v6 = vsel %vm3168_vm14, %v3167_v60, %v3135_v53 }
 0x489   : > { %v3170_v46 = vsel %vm2386_vm4, %v3169_v6, %v3139_v34 }
 0x48b   : > { %v3143_v30 = vpop.permute.xlu0 %3142  ;;  %v3147_v4 = vpop.permute.xlu1 %3146 }
 0x48c   : > { %v3172_v21 = vsel %vm3171_vm15, %v3170_v46, %v3143_v30 }
 0x48d   : > { %v3173_v3 = vsel %vm2403_vm5, %v3172_v21, %v3147_v4 }
 0x48f   : > { %v3151_v27 = vpop.permute.xlu0 %3150 }
 0x490   : > { %v3175_v19 = vsel %vm3174_vm0, %v3173_v3, %v3151_v27 }
 0x491   : > { %3176 = vst.msk [vmem:[%s5433_s27] sm:$0xff] %vm2420_vm7, %v3175_v19 }
 0x492   : > { %3908 = shalt.err (!%p3905_p7)
}
 0x493   : > { %s3909_s21 = scalar_lea.hbm %s5318_s10, 128  ;;  %s3913_s16 = scalar_lea.hbm %s5383_s7, 512 }
 0x494   : > { %p3910_p9 = scmp.ne.s32.totalorder %s5318_s10, %s3909_s21  ;;  %p3914_p12 = scmp.lt.u32.totalorder %s5318_s10, %s5383_s7 }
 0x495   : > { %p3915_p13 = scmp.lt.u32.totalorder %s3913_s16, %s3909_s21  ;;  %p3917_p1 = scmp.lt.u32.totalorder %s3909_s21, %s5318_s10 }
 0x496   : > { %p3911_p10 = pnand %p3910_p9, %p4101_p3 }
 0x497   : > { %p3916_p0 = por %p3915_p13, %p3914_p12 }
 0x498   : > { %p3912_p11 = pneg %p3911_p10 }
 0x499   : > { %p3918_p2 = por %p3917_p1, %p3916_p0 }
 0x49b   : > { %p3919_p4 = pnand %p3918_p2, %p3912_p11 }
 0x49d   : > { %3922 = shalt.err (!%p3919_p4)
}
 0x49e   : > { %3749 = dma.vmem_to_hbm [thread:$0]  (%p4101_p3), %s5320_s22, 128, %s5318_s10, %s3178_s2  }
 0x49f PF: > { %p3755_p5 = scmp.ge.s32.totalorder %s3989_s8, 2  ;;  %s3205_s27 = sand.u32 1, %s3961_s24  }
 0x4a0   : > { %s3206_s1 = scalar_lea.sflag [#allocation4], %s3205_s27 }
 0x4a1   : > { %p3752_p6 = pnand %p3755_p5, %p4110_p8 }
 0x4a3   : > { %3956 = dma.done.wait (!%p3752_p6), %s3206_s1, 128  }
 0x4a4   : > { %3958 = vsyncadd (!%p3752_p6), %s3206_s1, 4294967168  ;;  %s20_s8 = sadd.s32 1, %s3989_s8   ;;  %s5435_s24 = smov %s3965_s25 }
 0x4a5   : > { %p17_p7 = scmp.ge.s32.totalorder %s20_s8, 6   ;;  %s5436_s25 = smov %s3969_s26 }
 0x4a6   : > { %s5437_s26 = smov %s4119_s19  ;;  %s5438_s27 = smov %s3981_s29 }
 0x4a7   : > { %s5439_s28 = smov %s3985_s30  ;;  %s5440_s29 = smov %s5443_s11 }
 0x4a8   : > { %s5441_s30 = smov %s5447_s12  ;;  %19 = sbr.rel (!%p17_p7) target bundleno = 9 (0x9), region = 93 }
 0x4af   :  { %3211 = vsyncpa [#allocation4], 1 }
 0x4b0   :  { %3213 = vsyncpa [#allocation4 + $0x1], 1 }

</bundles_post_ra>
